<compile_context>
chip_gen: v6e
topology: v6e:2x2x1
jax: 0.10.0
libtpu: 0.0.40
codegen_flags: <defaults>
</compile_context>

<pallas_src>
import math
import functools

import jax
import jax.numpy as jnp
from jax.experimental import pallas as pl

# ----------------------------- model config (small) -----------------------------
SRC_VOCAB_SIZE = 50
EMBED_SIZE = 32
NUM_LAYERS = 2
HEADS = 4
FORWARD_EXPANSION = 4
MAX_LENGTH = 16
DROPOUT = 0.0           # eval-mode / identity
BATCH = 2
SEQ_LEN = 8
LN_EPS = 1e-5


# ----------------------------- shared math helpers ------------------------------
def _layernorm(x, gamma, beta):
    mu = jnp.mean(x, axis=-1, keepdims=True)
    xc = x - mu
    var = jnp.mean(xc * xc, axis=-1, keepdims=True)
    return xc * jax.lax.rsqrt(var + LN_EPS) * gamma + beta


# ----------------------------- Pallas kernel -------------------------------------
def fused_encoder_kernel(num_layers, heads, batch, seq, vocab,
                         tok_ref, emb_ref, wslab_ref, w1t_ref, w2t_ref, sv_ref,
                         o_ref):
    # tok_ref:   (N*S, 1)  int32 token ids
    # emb_ref:   (V + max_len, E)  [word_emb ; pos_emb] stacked
    # wslab_ref: (L, E, 4E)  [Wq_bd_t | Wk_bd_t | Wv_bd_t | Wo_t], all (in, out)
    # w1t_ref:   (L, E, fE)  W1.T
    # w2t_ref:   (L, fE, E)  W2.T
    # sv_ref:    (L, 7, fE)  rows = [bo, g1, b1, bb1, bb2, g2, b2] (E-wide zero-padded)
    NS = batch * seq
    E = emb_ref.shape[1]
    D = E // heads
    scale = 1.0 / math.sqrt(D)

    # ---- in-kernel embedding: word gather + positional add as ONE one-hot MXU matmul ----
    tok = tok_ref[...]                                                   # (NS, 1) int32
    col = jax.lax.broadcasted_iota(jnp.int32, (NS, emb_ref.shape[0]), 1)
    row = jax.lax.broadcasted_iota(jnp.int32, (NS, 1), 0)
    pos_idx = vocab + row % seq                                          # pos rows live after vocab rows
    sel = jnp.logical_or(col == tok, col == pos_idx).astype(jnp.float32)  # (NS, V+max_len)
    x = jnp.dot(sel, emb_ref[...], preferred_element_type=jnp.float32)   # (NS, E); dropout = identity

    # Static layer loop: NUM_LAYERS=2 so unrolling keeps live ranges tiny.
    # TODO(synk): switch to lax.fori_loop with dynamic layer indexing if NUM_LAYERS grows.
    for l in range(num_layers):
        slab = wslab_ref[l]                   # (E, 4E) lane-dense weight slab
        w1 = w1t_ref[l]                       # (E, fE)
        w2 = w2t_ref[l]                       # (fE, E)
        sv = sv_ref[l]                        # (7, fE)
        bo, g1, b1 = sv[0:1, :E], sv[1:2, :E], sv[2:3, :E]
        bb1 = sv[3:4, :]
        bb2, g2, b2 = sv[4:5, :E], sv[5:6, :E], sv[6:7, :E]
        wo = slab[:, 3 * E:]                  # (E, E) = Wo.T

        # ---- fused block-diagonal QKV projection: ONE MXU dot over the whole batch ----
        qkv = jnp.dot(x, slab[:, :3 * E], preferred_element_type=jnp.float32)   # (NS, 3E)

        # ---- per-head attention, batched over sequences (batch dim = N) ----
        heads_out = []
        for h in range(heads):
            c0 = h * D
            qh = qkv[:, c0:c0 + D].reshape(batch, seq, D)
            kh = qkv[:, E + c0:E + c0 + D].reshape(batch, seq, D)
            vh = qkv[:, 2 * E + c0:2 * E + c0 + D].reshape(batch, seq, D)
            energy = jnp.einsum('bqd,bkd->bqk', qh, kh,
                                preferred_element_type=jnp.float32) * scale      # (N, S, S)
            m = jnp.max(energy, axis=-1, keepdims=True)
            p = jnp.exp(energy - m)
            att = p * pl.reciprocal(jnp.sum(p, axis=-1, keepdims=True), approx=True)
            oh = jnp.einsum('bqk,bkd->bqd', att, vh,
                            preferred_element_type=jnp.float32)                  # (N, S, D)
            heads_out.append(oh)

        out_cat = jnp.concatenate(heads_out, axis=-1).reshape(NS, E)              # (NS, E)
        # fc_out + bias, entirely in registers (no o_ref round-trip).
        attn = jnp.dot(out_cat, wo, preferred_element_type=jnp.float32) + bo

        # ---- residual + LayerNorm 1 ----
        x1 = _layernorm(attn + x, g1, b1)

        # ---- feed forward (full-batch dots) ----
        h1 = jnp.maximum(jnp.dot(x1, w1, preferred_element_type=jnp.float32) + bb1, 0.0)
        ff = jnp.dot(h1, w2, preferred_element_type=jnp.float32) + bb2

        # ---- residual + LayerNorm 2 ----
        x = _layernorm(ff + x1, g2, b2)

    o_ref[...] = x


# ----------------------------- host-side weight packing --------------------------
def pack_params(params, heads):
    """Pre-transpose / block-diagonalize / pack all weights once (host-side)."""
    fE = params["layers"][0]["w1"].shape[0]
    eye = jnp.eye(heads, dtype=jnp.float32)

    def pad(v):
        return jnp.pad(v, (0, fE - v.shape[0]))

    wslab, w1t, w2t, smalls = [], [], [], []
    for lp in params["layers"]:
        slab = jnp.concatenate([jnp.kron(eye, lp["wq"].T),     # block-diag, (in, out)
                                jnp.kron(eye, lp["wk"].T),
                                jnp.kron(eye, lp["wv"].T),
                                lp["wo"].T], axis=1)           # (E, 4E) lane-dense slab
        wslab.append(slab)
        w1t.append(lp["w1"].T)
        w2t.append(lp["w2"].T)
        smalls.append(jnp.stack([pad(lp["bo"]), pad(lp["g1"]), pad(lp["b1"]),
                                 lp["bb1"], pad(lp["bb2"]), pad(lp["g2"]), pad(lp["b2"])]))
    emb_table = jnp.concatenate([params["word_emb"], params["pos_emb"]],
                                axis=0).astype(jnp.float32)    # (V + max_len, E)
    return {
        "emb": emb_table,
        "wslab": jnp.stack(wslab),     # (L, E, 4E)
        "w1t": jnp.stack(w1t),         # (L, E, fE)
        "w2t": jnp.stack(w2t),         # (L, fE, E)
        "smalls": jnp.stack(smalls),   # (L, 7, fE)
    }


# ----------------------------- full encoder (wrapper) ----------------------------
def transformer_encoder(tokens, packed, heads, vocab=SRC_VOCAB_SIZE):
    N, S = tokens.shape
    E = packed["emb"].shape[1]
    L = packed["w1t"].shape[0]

    tok_col = tokens.reshape(N * S, 1).astype(jnp.int32)   # only host-side op: 64-byte reshape

    out = pl.pallas_call(
        functools.partial(fused_encoder_kernel, L, heads, N, S, vocab),
        out_shape=jax.ShapeDtypeStruct((N * S, E), jnp.float32),
    )(tok_col, packed["emb"], packed["wslab"], packed["w1t"], packed["w2t"], packed["smalls"])
    return out.reshape(N, S, E)


# ----------------------------- pure-JAX reference --------------------------------
def _ref_block(x, p, heads):
    N, S, E = x.shape
    D = E // heads
    xh = x.reshape(N, S, heads, D)
    q = xh @ p["wq"].T
    k = xh @ p["wk"].T
    v = xh @ p["wv"].T
    energy = jnp.einsum("nqhd,nkhd->nhqk", q, k) / math.sqrt(D)
    att = jax.nn.softmax(energy, axis=3)
    out = jnp.einsum("nhql,nlhd->nqhd", att, v).reshape(N, S, E)
    out = out @ p["wo"].T + p["bo"]
    x1 = _layernorm(out + x, p["g1"], p["b1"])
    ff = jnp.maximum(x1 @ p["w1"].T + p["bb1"], 0.0) @ p["w2"].T + p["bb2"]
    return _layernorm(ff + x1, p["g2"], p["b2"])


def _ref_encoder(tokens, params, heads):
    N, S = tokens.shape
    out = params["word_emb"][tokens] + params["pos_emb"][jnp.arange(S)][None]
    out = out.astype(jnp.float32)
    for lp in params["layers"]:
        out = _ref_block(out, lp, heads)
    return out


# ----------------------------- param init ----------------------------------------
def init_params(key):
    E, H, fE = EMBED_SIZE, HEADS, FORWARD_EXPANSION * EMBED_SIZE
    D = E // H
    keys = jax.random.split(key, 4 + NUM_LAYERS)
    params = {
        "word_emb": 0.02 * jax.random.normal(keys[0], (SRC_VOCAB_SIZE, E), jnp.float32),
        "pos_emb": 0.02 * jax.random.normal(keys[1], (MAX_LENGTH, E), jnp.float32),
        "layers": [],
    }
    for l in range(NUM_LAYERS):
        lk = jax.random.split(keys[4 + l], 8)
        params["layers"].append({
            "wv": 0.1 * jax.random.normal(lk[0], (D, D), jnp.float32),
            "wk": 0.1 * jax.random.normal(lk[1], (D, D), jnp.float32),
            "wq": 0.1 * jax.random.normal(lk[2], (D, D), jnp.float32),
            "wo": 0.1 * jax.random.normal(lk[3], (E, E), jnp.float32),
            "bo": 0.01 * jax.random.normal(lk[4], (E,), jnp.float32),
            "g1": jnp.ones((E,), jnp.float32),
            "b1": jnp.zeros((E,), jnp.float32),
            "w1": 0.1 * jax.random.normal(lk[5], (fE, E), jnp.float32),
            "bb1": 0.01 * jax.random.normal(lk[6], (fE,), jnp.float32),
            "w2": 0.1 * jax.random.normal(lk[7], (E, fE), jnp.float32),
            "bb2": jnp.zeros((E,), jnp.float32),
            "g2": jnp.ones((E,), jnp.float32),
            "b2": jnp.zeros((E,), jnp.float32),
        })
    return params


# ----------------------------- main -----------------------------------------------
if __name__ == "__main__":
    key = jax.random.PRNGKey(0)
    pkey, tkey = jax.random.split(key)
    params = init_params(pkey)
    packed = pack_params(params, HEADS)   # host-side pre-transpose / block-diag / pack (once)
    tokens = jax.random.randint(tkey, (BATCH, SEQ_LEN), 0, SRC_VOCAB_SIZE, dtype=jnp.int32)

    fwd = jax.jit(functools.partial(transformer_encoder, heads=HEADS))
    out = jax.block_until_ready(fwd(tokens, packed))

    ref = jax.block_until_ready(_ref_encoder(tokens, params, HEADS))
    assert out.shape == (BATCH, SEQ_LEN, EMBED_SIZE)
    # approx=True softmax reciprocal (EUP) has ~2^-12 relative error; 2e-3 still catches any
    # real algorithmic mismatch (which would show up at O(0.1-1)).
    assert jnp.allclose(out, ref, atol=2e-3, rtol=2e-3), "mismatch vs pure-JAX reference"

    print("KERNEL_OK")
</pallas_src>

<mosaic_0001>
module attributes {stable_mosaic.version = 11 : i64} {
  func.func @fused_encoder_kernel(%arg0: memref<16x1xi32, #tpu.memory_space<vmem>>, %arg1: memref<66x32xf32, #tpu.memory_space<vmem>>, %arg2: memref<2x32x128xf32, #tpu.memory_space<vmem>>, %arg3: memref<2x32x128xf32, #tpu.memory_space<vmem>>, %arg4: memref<2x128x32xf32, #tpu.memory_space<vmem>>, %arg5: memref<2x7x128xf32, #tpu.memory_space<vmem>>, %arg6: memref<16x32xf32, #tpu.memory_space<vmem>>) attributes {dimension_semantics = [], scalar_prefetch = 0 : i64, scratch_operands = 0 : i64, tpu.core_type = #tpu.core_type<tc>} {
    %c0 = arith.constant 0 : index
    %c0_0 = arith.constant 0 : index
    %0 = vector.load %arg0[%c0, %c0_0] : memref<16x1xi32, #tpu.memory_space<vmem>>, vector<16x1xi32>
    %1 = tpu.iota {dimensions = array<i32: 1>} : vector<16x66xi32>
    %2 = tpu.iota {dimensions = array<i32: 0>} : vector<16x1xi32>
    %c8_i32 = arith.constant 8 : i32
    %c0_i32 = arith.constant 0 : i32
    %3 = arith.cmpi eq, %c8_i32, %c0_i32 : i32
    %c1_i32 = arith.constant 1 : i32
    %4 = arith.select %3, %c1_i32, %c8_i32 : i32
    %5 = vector.broadcast %4 : i32 to vector<16x1xi32>
    %6 = arith.remsi %2, %5 : vector<16x1xi32>
    %c0_i32_1 = arith.constant 0 : i32
    %7 = vector.broadcast %c0_i32_1 : i32 to vector<16x1xi32>
    %8 = arith.cmpi ne, %6, %7 : vector<16x1xi32>
    %c0_i32_2 = arith.constant 0 : i32
    %9 = vector.broadcast %c0_i32_2 : i32 to vector<16x1xi32>
    %10 = arith.cmpi slt, %6, %9 : vector<16x1xi32>
    %c0_i32_3 = arith.constant 0 : i32
    %11 = arith.cmpi slt, %4, %c0_i32_3 : i32
    %12 = vector.broadcast %11 : i1 to vector<16x1xi1>
    %13 = vector.broadcast %12 : vector<16x1xi1> to vector<16x1xi1>
    %14 = arith.xori %10, %13 : vector<16x1xi1>
    %15 = arith.andi %14, %8 : vector<16x1xi1>
    %16 = vector.broadcast %4 : i32 to vector<16x1xi32>
    %17 = arith.addi %6, %16 : vector<16x1xi32>
    %18 = arith.select %15, %17, %6 : vector<16x1xi1>, vector<16x1xi32>
    %c50_i32 = arith.constant 50 : i32
    %19 = vector.broadcast %c50_i32 : i32 to vector<16x1xi32>
    %20 = arith.addi %19, %18 : vector<16x1xi32>
    %21 = vector.broadcast %0 : vector<16x1xi32> to vector<16x66xi32>
    %22 = arith.cmpi eq, %1, %21 : vector<16x66xi32>
    %23 = vector.broadcast %20 : vector<16x1xi32> to vector<16x66xi32>
    %24 = arith.cmpi eq, %1, %23 : vector<16x66xi32>
    %25 = arith.ori %22, %24 : vector<16x66xi1>
    %26 = arith.extui %25 : vector<16x66xi1> to vector<16x66xi32>
    %27 = arith.sitofp %26 : vector<16x66xi32> to vector<16x66xf32>
    %c0_4 = arith.constant 0 : index
    %c0_5 = arith.constant 0 : index
    %28 = vector.load %arg1[%c0_4, %c0_5] : memref<66x32xf32, #tpu.memory_space<vmem>>, vector<66x32xf32>
    %cst = arith.constant dense<0.000000e+00> : vector<16x32xf32>
    %29 = tpu.matmul %27, %28, %cst {dimension_numbers = #tpu.dot_dimension_numbers<[1], [0], [0], [1], [0, 0, 1, 1], [], []>} : vector<16x66xf32>, vector<66x32xf32>, vector<16x32xf32> -> vector<16x32xf32>
    %c0_6 = arith.constant 0 : index
    %c0_7 = arith.constant 0 : index
    %c0_8 = arith.constant 0 : index
    %30 = vector.load %arg2[%c0_6, %c0_7, %c0_8] : memref<2x32x128xf32, #tpu.memory_space<vmem>>, vector<1x32x128xf32>
    %31 = vector.shape_cast %30 : vector<1x32x128xf32> to vector<32x128xf32>
    %c0_9 = arith.constant 0 : index
    %c0_10 = arith.constant 0 : index
    %c0_11 = arith.constant 0 : index
    %32 = vector.load %arg3[%c0_9, %c0_10, %c0_11] : memref<2x32x128xf32, #tpu.memory_space<vmem>>, vector<1x32x128xf32>
    %33 = vector.shape_cast %32 : vector<1x32x128xf32> to vector<32x128xf32>
    %c0_12 = arith.constant 0 : index
    %c0_13 = arith.constant 0 : index
    %c0_14 = arith.constant 0 : index
    %34 = vector.load %arg4[%c0_12, %c0_13, %c0_14] : memref<2x128x32xf32, #tpu.memory_space<vmem>>, vector<1x128x32xf32>
    %35 = vector.shape_cast %34 : vector<1x128x32xf32> to vector<128x32xf32>
    %c0_15 = arith.constant 0 : index
    %c0_16 = arith.constant 0 : index
    %c0_17 = arith.constant 0 : index
    %36 = vector.load %arg5[%c0_15, %c0_16, %c0_17] : memref<2x7x128xf32, #tpu.memory_space<vmem>>, vector<1x7x128xf32>
    %37 = vector.shape_cast %36 : vector<1x7x128xf32> to vector<7x128xf32>
    %38 = vector.extract_strided_slice %37 {offsets = [0, 0], sizes = [1, 32], strides = [1, 1]} : vector<7x128xf32> to vector<1x32xf32>
    %39 = vector.extract_strided_slice %37 {offsets = [1, 0], sizes = [1, 32], strides = [1, 1]} : vector<7x128xf32> to vector<1x32xf32>
    %40 = vector.extract_strided_slice %37 {offsets = [2, 0], sizes = [1, 32], strides = [1, 1]} : vector<7x128xf32> to vector<1x32xf32>
    %41 = vector.extract_strided_slice %37 {offsets = [3, 0], sizes = [1, 128], strides = [1, 1]} : vector<7x128xf32> to vector<1x128xf32>
    %42 = vector.extract_strided_slice %37 {offsets = [4, 0], sizes = [1, 32], strides = [1, 1]} : vector<7x128xf32> to vector<1x32xf32>
    %43 = vector.extract_strided_slice %37 {offsets = [5, 0], sizes = [1, 32], strides = [1, 1]} : vector<7x128xf32> to vector<1x32xf32>
    %44 = vector.extract_strided_slice %37 {offsets = [6, 0], sizes = [1, 32], strides = [1, 1]} : vector<7x128xf32> to vector<1x32xf32>
    %45 = vector.extract_strided_slice %31 {offsets = [0, 96], sizes = [32, 32], strides = [1, 1]} : vector<32x128xf32> to vector<32x32xf32>
    %46 = vector.extract_strided_slice %31 {offsets = [0, 0], sizes = [32, 96], strides = [1, 1]} : vector<32x128xf32> to vector<32x96xf32>
    %cst_18 = arith.constant dense<0.000000e+00> : vector<16x96xf32>
    %47 = tpu.matmul %29, %46, %cst_18 {dimension_numbers = #tpu.dot_dimension_numbers<[1], [0], [0], [1], [0, 0, 1, 1], [], []>} : vector<16x32xf32>, vector<32x96xf32>, vector<16x96xf32> -> vector<16x96xf32>
    %48 = vector.extract_strided_slice %47 {offsets = [0, 0], sizes = [16, 8], strides = [1, 1]} : vector<16x96xf32> to vector<16x8xf32>
    %49 = vector.shape_cast %48 : vector<16x8xf32> to vector<2x8x8xf32>
    %50 = vector.extract_strided_slice %47 {offsets = [0, 32], sizes = [16, 8], strides = [1, 1]} : vector<16x96xf32> to vector<16x8xf32>
    %51 = vector.shape_cast %50 : vector<16x8xf32> to vector<2x8x8xf32>
    %52 = vector.extract_strided_slice %47 {offsets = [0, 64], sizes = [16, 8], strides = [1, 1]} : vector<16x96xf32> to vector<16x8xf32>
    %53 = vector.shape_cast %52 : vector<16x8xf32> to vector<2x8x8xf32>
    "tpu.trace_start"() <{level = 10 : i32, message = "bqd,bkd->bqk"}> : () -> ()
    %cst_19 = arith.constant dense<0.000000e+00> : vector<2x8x8xf32>
    %54 = tpu.matmul %49, %51, %cst_19 {dimension_numbers = #tpu.dot_dimension_numbers<[2], [2], [1], [1], [0, 0, 0, 1, 1, 1], [0], [0]>} : vector<2x8x8xf32>, vector<2x8x8xf32>, vector<2x8x8xf32> -> vector<2x8x8xf32>
    "tpu.trace_stop"() : () -> ()
    %cst_20 = arith.constant 0.353553385 : f32
    %55 = vector.broadcast %cst_20 : f32 to vector<2x8x8xf32>
    %56 = arith.mulf %54, %55 : vector<2x8x8xf32>
    %cst_21 = arith.constant dense<0xFF800000> : vector<2x8xf32>
    %57 = vector.multi_reduction <maximumf>, %56, %cst_21 [2] : vector<2x8x8xf32> to vector<2x8xf32>
    %58 = vector.shape_cast %57 : vector<2x8xf32> to vector<2x8x1xf32>
    %59 = vector.broadcast %58 : vector<2x8x1xf32> to vector<2x8x8xf32>
    %60 = arith.subf %56, %59 : vector<2x8x8xf32>
    %61 = math.exp %60 : vector<2x8x8xf32>
    %cst_22 = arith.constant dense<0.000000e+00> : vector<2x8xf32>
    %62 = vector.multi_reduction <add>, %61, %cst_22 [2] : vector<2x8x8xf32> to vector<2x8xf32>
    %63 = vector.shape_cast %62 : vector<2x8xf32> to vector<2x8x1xf32>
    %64 = tpu.reciprocal %63 {approx = true} : vector<2x8x1xf32> -> vector<2x8x1xf32>
    %65 = vector.broadcast %64 : vector<2x8x1xf32> to vector<2x8x8xf32>
    %66 = arith.mulf %61, %65 : vector<2x8x8xf32>
    "tpu.trace_start"() <{level = 10 : i32, message = "bqk,bkd->bqd"}> : () -> ()
    %cst_23 = arith.constant dense<0.000000e+00> : vector<2x8x8xf32>
    %67 = tpu.matmul %66, %53, %cst_23 {dimension_numbers = #tpu.dot_dimension_numbers<[2], [1], [1], [2], [0, 0, 0, 1, 1, 2], [0], [0]>} : vector<2x8x8xf32>, vector<2x8x8xf32>, vector<2x8x8xf32> -> vector<2x8x8xf32>
    "tpu.trace_stop"() : () -> ()
    %68 = vector.extract_strided_slice %47 {offsets = [0, 8], sizes = [16, 8], strides = [1, 1]} : vector<16x96xf32> to vector<16x8xf32>
    %69 = vector.shape_cast %68 : vector<16x8xf32> to vector<2x8x8xf32>
    %70 = vector.extract_strided_slice %47 {offsets = [0, 40], sizes = [16, 8], strides = [1, 1]} : vector<16x96xf32> to vector<16x8xf32>
    %71 = vector.shape_cast %70 : vector<16x8xf32> to vector<2x8x8xf32>
    %72 = vector.extract_strided_slice %47 {offsets = [0, 72], sizes = [16, 8], strides = [1, 1]} : vector<16x96xf32> to vector<16x8xf32>
    %73 = vector.shape_cast %72 : vector<16x8xf32> to vector<2x8x8xf32>
    "tpu.trace_start"() <{level = 10 : i32, message = "bqd,bkd->bqk"}> : () -> ()
    %cst_24 = arith.constant dense<0.000000e+00> : vector<2x8x8xf32>
    %74 = tpu.matmul %69, %71, %cst_24 {dimension_numbers = #tpu.dot_dimension_numbers<[2], [2], [1], [1], [0, 0, 0, 1, 1, 1], [0], [0]>} : vector<2x8x8xf32>, vector<2x8x8xf32>, vector<2x8x8xf32> -> vector<2x8x8xf32>
    "tpu.trace_stop"() : () -> ()
    %cst_25 = arith.constant 0.353553385 : f32
    %75 = vector.broadcast %cst_25 : f32 to vector<2x8x8xf32>
    %76 = arith.mulf %74, %75 : vector<2x8x8xf32>
    %cst_26 = arith.constant dense<0xFF800000> : vector<2x8xf32>
    %77 = vector.multi_reduction <maximumf>, %76, %cst_26 [2] : vector<2x8x8xf32> to vector<2x8xf32>
    %78 = vector.shape_cast %77 : vector<2x8xf32> to vector<2x8x1xf32>
    %79 = vector.broadcast %78 : vector<2x8x1xf32> to vector<2x8x8xf32>
    %80 = arith.subf %76, %79 : vector<2x8x8xf32>
    %81 = math.exp %80 : vector<2x8x8xf32>
    %cst_27 = arith.constant dense<0.000000e+00> : vector<2x8xf32>
    %82 = vector.multi_reduction <add>, %81, %cst_27 [2] : vector<2x8x8xf32> to vector<2x8xf32>
    %83 = vector.shape_cast %82 : vector<2x8xf32> to vector<2x8x1xf32>
    %84 = tpu.reciprocal %83 {approx = true} : vector<2x8x1xf32> -> vector<2x8x1xf32>
    %85 = vector.broadcast %84 : vector<2x8x1xf32> to vector<2x8x8xf32>
    %86 = arith.mulf %81, %85 : vector<2x8x8xf32>
    "tpu.trace_start"() <{level = 10 : i32, message = "bqk,bkd->bqd"}> : () -> ()
    %cst_28 = arith.constant dense<0.000000e+00> : vector<2x8x8xf32>
    %87 = tpu.matmul %86, %73, %cst_28 {dimension_numbers = #tpu.dot_dimension_numbers<[2], [1], [1], [2], [0, 0, 0, 1, 1, 2], [0], [0]>} : vector<2x8x8xf32>, vector<2x8x8xf32>, vector<2x8x8xf32> -> vector<2x8x8xf32>
    "tpu.trace_stop"() : () -> ()
    %88 = vector.extract_strided_slice %47 {offsets = [0, 16], sizes = [16, 8], strides = [1, 1]} : vector<16x96xf32> to vector<16x8xf32>
    %89 = vector.shape_cast %88 : vector<16x8xf32> to vector<2x8x8xf32>
    %90 = vector.extract_strided_slice %47 {offsets = [0, 48], sizes = [16, 8], strides = [1, 1]} : vector<16x96xf32> to vector<16x8xf32>
    %91 = vector.shape_cast %90 : vector<16x8xf32> to vector<2x8x8xf32>
    %92 = vector.extract_strided_slice %47 {offsets = [0, 80], sizes = [16, 8], strides = [1, 1]} : vector<16x96xf32> to vector<16x8xf32>
    %93 = vector.shape_cast %92 : vector<16x8xf32> to vector<2x8x8xf32>
    "tpu.trace_start"() <{level = 10 : i32, message = "bqd,bkd->bqk"}> : () -> ()
    %cst_29 = arith.constant dense<0.000000e+00> : vector<2x8x8xf32>
    %94 = tpu.matmul %89, %91, %cst_29 {dimension_numbers = #tpu.dot_dimension_numbers<[2], [2], [1], [1], [0, 0, 0, 1, 1, 1], [0], [0]>} : vector<2x8x8xf32>, vector<2x8x8xf32>, vector<2x8x8xf32> -> vector<2x8x8xf32>
    "tpu.trace_stop"() : () -> ()
    %cst_30 = arith.constant 0.353553385 : f32
    %95 = vector.broadcast %cst_30 : f32 to vector<2x8x8xf32>
    %96 = arith.mulf %94, %95 : vector<2x8x8xf32>
    %cst_31 = arith.constant dense<0xFF800000> : vector<2x8xf32>
    %97 = vector.multi_reduction <maximumf>, %96, %cst_31 [2] : vector<2x8x8xf32> to vector<2x8xf32>
    %98 = vector.shape_cast %97 : vector<2x8xf32> to vector<2x8x1xf32>
    %99 = vector.broadcast %98 : vector<2x8x1xf32> to vector<2x8x8xf32>
    %100 = arith.subf %96, %99 : vector<2x8x8xf32>
    %101 = math.exp %100 : vector<2x8x8xf32>
    %cst_32 = arith.constant dense<0.000000e+00> : vector<2x8xf32>
    %102 = vector.multi_reduction <add>, %101, %cst_32 [2] : vector<2x8x8xf32> to vector<2x8xf32>
    %103 = vector.shape_cast %102 : vector<2x8xf32> to vector<2x8x1xf32>
    %104 = tpu.reciprocal %103 {approx = true} : vector<2x8x1xf32> -> vector<2x8x1xf32>
    %105 = vector.broadcast %104 : vector<2x8x1xf32> to vector<2x8x8xf32>
    %106 = arith.mulf %101, %105 : vector<2x8x8xf32>
    "tpu.trace_start"() <{level = 10 : i32, message = "bqk,bkd->bqd"}> : () -> ()
    %cst_33 = arith.constant dense<0.000000e+00> : vector<2x8x8xf32>
    %107 = tpu.matmul %106, %93, %cst_33 {dimension_numbers = #tpu.dot_dimension_numbers<[2], [1], [1], [2], [0, 0, 0, 1, 1, 2], [0], [0]>} : vector<2x8x8xf32>, vector<2x8x8xf32>, vector<2x8x8xf32> -> vector<2x8x8xf32>
    "tpu.trace_stop"() : () -> ()
    %108 = vector.extract_strided_slice %47 {offsets = [0, 24], sizes = [16, 8], strides = [1, 1]} : vector<16x96xf32> to vector<16x8xf32>
    %109 = vector.shape_cast %108 : vector<16x8xf32> to vector<2x8x8xf32>
    %110 = vector.extract_strided_slice %47 {offsets = [0, 56], sizes = [16, 8], strides = [1, 1]} : vector<16x96xf32> to vector<16x8xf32>
    %111 = vector.shape_cast %110 : vector<16x8xf32> to vector<2x8x8xf32>
    %112 = vector.extract_strided_slice %47 {offsets = [0, 88], sizes = [16, 8], strides = [1, 1]} : vector<16x96xf32> to vector<16x8xf32>
    %113 = vector.shape_cast %112 : vector<16x8xf32> to vector<2x8x8xf32>
    "tpu.trace_start"() <{level = 10 : i32, message = "bqd,bkd->bqk"}> : () -> ()
    %cst_34 = arith.constant dense<0.000000e+00> : vector<2x8x8xf32>
    %114 = tpu.matmul %109, %111, %cst_34 {dimension_numbers = #tpu.dot_dimension_numbers<[2], [2], [1], [1], [0, 0, 0, 1, 1, 1], [0], [0]>} : vector<2x8x8xf32>, vector<2x8x8xf32>, vector<2x8x8xf32> -> vector<2x8x8xf32>
    "tpu.trace_stop"() : () -> ()
    %cst_35 = arith.constant 0.353553385 : f32
    %115 = vector.broadcast %cst_35 : f32 to vector<2x8x8xf32>
    %116 = arith.mulf %114, %115 : vector<2x8x8xf32>
    %cst_36 = arith.constant dense<0xFF800000> : vector<2x8xf32>
    %117 = vector.multi_reduction <maximumf>, %116, %cst_36 [2] : vector<2x8x8xf32> to vector<2x8xf32>
    %118 = vector.shape_cast %117 : vector<2x8xf32> to vector<2x8x1xf32>
    %119 = vector.broadcast %118 : vector<2x8x1xf32> to vector<2x8x8xf32>
    %120 = arith.subf %116, %119 : vector<2x8x8xf32>
    %121 = math.exp %120 : vector<2x8x8xf32>
    %cst_37 = arith.constant dense<0.000000e+00> : vector<2x8xf32>
    %122 = vector.multi_reduction <add>, %121, %cst_37 [2] : vector<2x8x8xf32> to vector<2x8xf32>
    %123 = vector.shape_cast %122 : vector<2x8xf32> to vector<2x8x1xf32>
    %124 = tpu.reciprocal %123 {approx = true} : vector<2x8x1xf32> -> vector<2x8x1xf32>
    %125 = vector.broadcast %124 : vector<2x8x1xf32> to vector<2x8x8xf32>
    %126 = arith.mulf %121, %125 : vector<2x8x8xf32>
    "tpu.trace_start"() <{level = 10 : i32, message = "bqk,bkd->bqd"}> : () -> ()
    %cst_38 = arith.constant dense<0.000000e+00> : vector<2x8x8xf32>
    %127 = tpu.matmul %126, %113, %cst_38 {dimension_numbers = #tpu.dot_dimension_numbers<[2], [1], [1], [2], [0, 0, 0, 1, 1, 2], [0], [0]>} : vector<2x8x8xf32>, vector<2x8x8xf32>, vector<2x8x8xf32> -> vector<2x8x8xf32>
    "tpu.trace_stop"() : () -> ()
    %128 = tpu.concatenate %67, %87, %107, %127 in 2 : vector<2x8x8xf32>, vector<2x8x8xf32>, vector<2x8x8xf32>, vector<2x8x8xf32> -> vector<2x8x32xf32>
    %129 = vector.shape_cast %128 : vector<2x8x32xf32> to vector<16x32xf32>
    %cst_39 = arith.constant dense<0.000000e+00> : vector<16x32xf32>
    %130 = tpu.matmul %129, %45, %cst_39 {dimension_numbers = #tpu.dot_dimension_numbers<[1], [0], [0], [1], [0, 0, 1, 1], [], []>} : vector<16x32xf32>, vector<32x32xf32>, vector<16x32xf32> -> vector<16x32xf32>
    %131 = vector.broadcast %38 : vector<1x32xf32> to vector<16x32xf32>
    %132 = arith.addf %130, %131 : vector<16x32xf32>
    %133 = arith.addf %132, %29 : vector<16x32xf32>
    %cst_40 = arith.constant dense<0.000000e+00> : vector<16xf32>
    %134 = vector.multi_reduction <add>, %133, %cst_40 [1] : vector<16x32xf32> to vector<16xf32>
    %135 = vector.shape_cast %134 : vector<16xf32> to vector<16x1xf32>
    %cst_41 = arith.constant 3.200000e+01 : f32
    %136 = vector.broadcast %cst_41 : f32 to vector<16x1xf32>
    %137 = arith.divf %135, %136 : vector<16x1xf32>
    %138 = vector.broadcast %137 : vector<16x1xf32> to vector<16x32xf32>
    %139 = arith.subf %133, %138 : vector<16x32xf32>
    %140 = arith.mulf %139, %139 : vector<16x32xf32>
    %cst_42 = arith.constant dense<0.000000e+00> : vector<16xf32>
    %141 = vector.multi_reduction <add>, %140, %cst_42 [1] : vector<16x32xf32> to vector<16xf32>
    %142 = vector.shape_cast %141 : vector<16xf32> to vector<16x1xf32>
    %cst_43 = arith.constant 3.200000e+01 : f32
    %143 = vector.broadcast %cst_43 : f32 to vector<16x1xf32>
    %144 = arith.divf %142, %143 : vector<16x1xf32>
    %cst_44 = arith.constant 9.99999974E-6 : f32
    %145 = vector.broadcast %cst_44 : f32 to vector<16x1xf32>
    %146 = arith.addf %144, %145 : vector<16x1xf32>
    %147 = math.rsqrt %146 : vector<16x1xf32>
    %148 = vector.broadcast %147 : vector<16x1xf32> to vector<16x32xf32>
    %149 = arith.mulf %139, %148 : vector<16x32xf32>
    %150 = vector.broadcast %39 : vector<1x32xf32> to vector<16x32xf32>
    %151 = arith.mulf %149, %150 : vector<16x32xf32>
    %152 = vector.broadcast %40 : vector<1x32xf32> to vector<16x32xf32>
    %153 = arith.addf %151, %152 : vector<16x32xf32>
    %cst_45 = arith.constant dense<0.000000e+00> : vector<16x128xf32>
    %154 = tpu.matmul %153, %33, %cst_45 {dimension_numbers = #tpu.dot_dimension_numbers<[1], [0], [0], [1], [0, 0, 1, 1], [], []>} : vector<16x32xf32>, vector<32x128xf32>, vector<16x128xf32> -> vector<16x128xf32>
    %155 = vector.broadcast %41 : vector<1x128xf32> to vector<16x128xf32>
    %156 = arith.addf %154, %155 : vector<16x128xf32>
    %cst_46 = arith.constant 0.000000e+00 : f32
    %157 = vector.broadcast %cst_46 : f32 to vector<16x128xf32>
    %158 = arith.maximumf %156, %157 : vector<16x128xf32>
    %cst_47 = arith.constant dense<0.000000e+00> : vector<16x32xf32>
    %159 = tpu.matmul %158, %35, %cst_47 {dimension_numbers = #tpu.dot_dimension_numbers<[1], [0], [0], [1], [0, 0, 1, 1], [], []>} : vector<16x128xf32>, vector<128x32xf32>, vector<16x32xf32> -> vector<16x32xf32>
    %160 = vector.broadcast %42 : vector<1x32xf32> to vector<16x32xf32>
    %161 = arith.addf %159, %160 : vector<16x32xf32>
    %162 = arith.addf %161, %153 : vector<16x32xf32>
    %cst_48 = arith.constant dense<0.000000e+00> : vector<16xf32>
    %163 = vector.multi_reduction <add>, %162, %cst_48 [1] : vector<16x32xf32> to vector<16xf32>
    %164 = vector.shape_cast %163 : vector<16xf32> to vector<16x1xf32>
    %cst_49 = arith.constant 3.200000e+01 : f32
    %165 = vector.broadcast %cst_49 : f32 to vector<16x1xf32>
    %166 = arith.divf %164, %165 : vector<16x1xf32>
    %167 = vector.broadcast %166 : vector<16x1xf32> to vector<16x32xf32>
    %168 = arith.subf %162, %167 : vector<16x32xf32>
    %169 = arith.mulf %168, %168 : vector<16x32xf32>
    %cst_50 = arith.constant dense<0.000000e+00> : vector<16xf32>
    %170 = vector.multi_reduction <add>, %169, %cst_50 [1] : vector<16x32xf32> to vector<16xf32>
    %171 = vector.shape_cast %170 : vector<16xf32> to vector<16x1xf32>
    %cst_51 = arith.constant 3.200000e+01 : f32
    %172 = vector.broadcast %cst_51 : f32 to vector<16x1xf32>
    %173 = arith.divf %171, %172 : vector<16x1xf32>
    %cst_52 = arith.constant 9.99999974E-6 : f32
    %174 = vector.broadcast %cst_52 : f32 to vector<16x1xf32>
    %175 = arith.addf %173, %174 : vector<16x1xf32>
    %176 = math.rsqrt %175 : vector<16x1xf32>
    %177 = vector.broadcast %176 : vector<16x1xf32> to vector<16x32xf32>
    %178 = arith.mulf %168, %177 : vector<16x32xf32>
    %179 = vector.broadcast %43 : vector<1x32xf32> to vector<16x32xf32>
    %180 = arith.mulf %178, %179 : vector<16x32xf32>
    %181 = vector.broadcast %44 : vector<1x32xf32> to vector<16x32xf32>
    %182 = arith.addf %180, %181 : vector<16x32xf32>
    %c1 = arith.constant 1 : index
    %c0_53 = arith.constant 0 : index
    %c0_54 = arith.constant 0 : index
    %183 = vector.load %arg2[%c1, %c0_53, %c0_54] : memref<2x32x128xf32, #tpu.memory_space<vmem>>, vector<1x32x128xf32>
    %184 = vector.shape_cast %183 : vector<1x32x128xf32> to vector<32x128xf32>
    %c1_55 = arith.constant 1 : index
    %c0_56 = arith.constant 0 : index
    %c0_57 = arith.constant 0 : index
    %185 = vector.load %arg3[%c1_55, %c0_56, %c0_57] : memref<2x32x128xf32, #tpu.memory_space<vmem>>, vector<1x32x128xf32>
    %186 = vector.shape_cast %185 : vector<1x32x128xf32> to vector<32x128xf32>
    %c1_58 = arith.constant 1 : index
    %c0_59 = arith.constant 0 : index
    %c0_60 = arith.constant 0 : index
    %187 = vector.load %arg4[%c1_58, %c0_59, %c0_60] : memref<2x128x32xf32, #tpu.memory_space<vmem>>, vector<1x128x32xf32>
    %188 = vector.shape_cast %187 : vector<1x128x32xf32> to vector<128x32xf32>
    %c1_61 = arith.constant 1 : index
    %c0_62 = arith.constant 0 : index
    %c0_63 = arith.constant 0 : index
    %189 = vector.load %arg5[%c1_61, %c0_62, %c0_63] : memref<2x7x128xf32, #tpu.memory_space<vmem>>, vector<1x7x128xf32>
    %190 = vector.shape_cast %189 : vector<1x7x128xf32> to vector<7x128xf32>
    %191 = vector.extract_strided_slice %190 {offsets = [0, 0], sizes = [1, 32], strides = [1, 1]} : vector<7x128xf32> to vector<1x32xf32>
    %192 = vector.extract_strided_slice %190 {offsets = [1, 0], sizes = [1, 32], strides = [1, 1]} : vector<7x128xf32> to vector<1x32xf32>
    %193 = vector.extract_strided_slice %190 {offsets = [2, 0], sizes = [1, 32], strides = [1, 1]} : vector<7x128xf32> to vector<1x32xf32>
    %194 = vector.extract_strided_slice %190 {offsets = [3, 0], sizes = [1, 128], strides = [1, 1]} : vector<7x128xf32> to vector<1x128xf32>
    %195 = vector.extract_strided_slice %190 {offsets = [4, 0], sizes = [1, 32], strides = [1, 1]} : vector<7x128xf32> to vector<1x32xf32>
    %196 = vector.extract_strided_slice %190 {offsets = [5, 0], sizes = [1, 32], strides = [1, 1]} : vector<7x128xf32> to vector<1x32xf32>
    %197 = vector.extract_strided_slice %190 {offsets = [6, 0], sizes = [1, 32], strides = [1, 1]} : vector<7x128xf32> to vector<1x32xf32>
    %198 = vector.extract_strided_slice %184 {offsets = [0, 96], sizes = [32, 32], strides = [1, 1]} : vector<32x128xf32> to vector<32x32xf32>
    %199 = vector.extract_strided_slice %184 {offsets = [0, 0], sizes = [32, 96], strides = [1, 1]} : vector<32x128xf32> to vector<32x96xf32>
    %cst_64 = arith.constant dense<0.000000e+00> : vector<16x96xf32>
    %200 = tpu.matmul %182, %199, %cst_64 {dimension_numbers = #tpu.dot_dimension_numbers<[1], [0], [0], [1], [0, 0, 1, 1], [], []>} : vector<16x32xf32>, vector<32x96xf32>, vector<16x96xf32> -> vector<16x96xf32>
    %201 = vector.extract_strided_slice %200 {offsets = [0, 0], sizes = [16, 8], strides = [1, 1]} : vector<16x96xf32> to vector<16x8xf32>
    %202 = vector.shape_cast %201 : vector<16x8xf32> to vector<2x8x8xf32>
    %203 = vector.extract_strided_slice %200 {offsets = [0, 32], sizes = [16, 8], strides = [1, 1]} : vector<16x96xf32> to vector<16x8xf32>
    %204 = vector.shape_cast %203 : vector<16x8xf32> to vector<2x8x8xf32>
    %205 = vector.extract_strided_slice %200 {offsets = [0, 64], sizes = [16, 8], strides = [1, 1]} : vector<16x96xf32> to vector<16x8xf32>
    %206 = vector.shape_cast %205 : vector<16x8xf32> to vector<2x8x8xf32>
    "tpu.trace_start"() <{level = 10 : i32, message = "bqd,bkd->bqk"}> : () -> ()
    %cst_65 = arith.constant dense<0.000000e+00> : vector<2x8x8xf32>
    %207 = tpu.matmul %202, %204, %cst_65 {dimension_numbers = #tpu.dot_dimension_numbers<[2], [2], [1], [1], [0, 0, 0, 1, 1, 1], [0], [0]>} : vector<2x8x8xf32>, vector<2x8x8xf32>, vector<2x8x8xf32> -> vector<2x8x8xf32>
    "tpu.trace_stop"() : () -> ()
    %cst_66 = arith.constant 0.353553385 : f32
    %208 = vector.broadcast %cst_66 : f32 to vector<2x8x8xf32>
    %209 = arith.mulf %207, %208 : vector<2x8x8xf32>
    %cst_67 = arith.constant dense<0xFF800000> : vector<2x8xf32>
    %210 = vector.multi_reduction <maximumf>, %209, %cst_67 [2] : vector<2x8x8xf32> to vector<2x8xf32>
    %211 = vector.shape_cast %210 : vector<2x8xf32> to vector<2x8x1xf32>
    %212 = vector.broadcast %211 : vector<2x8x1xf32> to vector<2x8x8xf32>
    %213 = arith.subf %209, %212 : vector<2x8x8xf32>
    %214 = math.exp %213 : vector<2x8x8xf32>
    %cst_68 = arith.constant dense<0.000000e+00> : vector<2x8xf32>
    %215 = vector.multi_reduction <add>, %214, %cst_68 [2] : vector<2x8x8xf32> to vector<2x8xf32>
    %216 = vector.shape_cast %215 : vector<2x8xf32> to vector<2x8x1xf32>
    %217 = tpu.reciprocal %216 {approx = true} : vector<2x8x1xf32> -> vector<2x8x1xf32>
    %218 = vector.broadcast %217 : vector<2x8x1xf32> to vector<2x8x8xf32>
    %219 = arith.mulf %214, %218 : vector<2x8x8xf32>
    "tpu.trace_start"() <{level = 10 : i32, message = "bqk,bkd->bqd"}> : () -> ()
    %cst_69 = arith.constant dense<0.000000e+00> : vector<2x8x8xf32>
    %220 = tpu.matmul %219, %206, %cst_69 {dimension_numbers = #tpu.dot_dimension_numbers<[2], [1], [1], [2], [0, 0, 0, 1, 1, 2], [0], [0]>} : vector<2x8x8xf32>, vector<2x8x8xf32>, vector<2x8x8xf32> -> vector<2x8x8xf32>
    "tpu.trace_stop"() : () -> ()
    %221 = vector.extract_strided_slice %200 {offsets = [0, 8], sizes = [16, 8], strides = [1, 1]} : vector<16x96xf32> to vector<16x8xf32>
    %222 = vector.shape_cast %221 : vector<16x8xf32> to vector<2x8x8xf32>
    %223 = vector.extract_strided_slice %200 {offsets = [0, 40], sizes = [16, 8], strides = [1, 1]} : vector<16x96xf32> to vector<16x8xf32>
    %224 = vector.shape_cast %223 : vector<16x8xf32> to vector<2x8x8xf32>
    %225 = vector.extract_strided_slice %200 {offsets = [0, 72], sizes = [16, 8], strides = [1, 1]} : vector<16x96xf32> to vector<16x8xf32>
    %226 = vector.shape_cast %225 : vector<16x8xf32> to vector<2x8x8xf32>
    "tpu.trace_start"() <{level = 10 : i32, message = "bqd,bkd->bqk"}> : () -> ()
    %cst_70 = arith.constant dense<0.000000e+00> : vector<2x8x8xf32>
    %227 = tpu.matmul %222, %224, %cst_70 {dimension_numbers = #tpu.dot_dimension_numbers<[2], [2], [1], [1], [0, 0, 0, 1, 1, 1], [0], [0]>} : vector<2x8x8xf32>, vector<2x8x8xf32>, vector<2x8x8xf32> -> vector<2x8x8xf32>
    "tpu.trace_stop"() : () -> ()
    %cst_71 = arith.constant 0.353553385 : f32
    %228 = vector.broadcast %cst_71 : f32 to vector<2x8x8xf32>
    %229 = arith.mulf %227, %228 : vector<2x8x8xf32>
    %cst_72 = arith.constant dense<0xFF800000> : vector<2x8xf32>
    %230 = vector.multi_reduction <maximumf>, %229, %cst_72 [2] : vector<2x8x8xf32> to vector<2x8xf32>
    %231 = vector.shape_cast %230 : vector<2x8xf32> to vector<2x8x1xf32>
    %232 = vector.broadcast %231 : vector<2x8x1xf32> to vector<2x8x8xf32>
    %233 = arith.subf %229, %232 : vector<2x8x8xf32>
    %234 = math.exp %233 : vector<2x8x8xf32>
    %cst_73 = arith.constant dense<0.000000e+00> : vector<2x8xf32>
    %235 = vector.multi_reduction <add>, %234, %cst_73 [2] : vector<2x8x8xf32> to vector<2x8xf32>
    %236 = vector.shape_cast %235 : vector<2x8xf32> to vector<2x8x1xf32>
    %237 = tpu.reciprocal %236 {approx = true} : vector<2x8x1xf32> -> vector<2x8x1xf32>
    %238 = vector.broadcast %237 : vector<2x8x1xf32> to vector<2x8x8xf32>
    %239 = arith.mulf %234, %238 : vector<2x8x8xf32>
    "tpu.trace_start"() <{level = 10 : i32, message = "bqk,bkd->bqd"}> : () -> ()
    %cst_74 = arith.constant dense<0.000000e+00> : vector<2x8x8xf32>
    %240 = tpu.matmul %239, %226, %cst_74 {dimension_numbers = #tpu.dot_dimension_numbers<[2], [1], [1], [2], [0, 0, 0, 1, 1, 2], [0], [0]>} : vector<2x8x8xf32>, vector<2x8x8xf32>, vector<2x8x8xf32> -> vector<2x8x8xf32>
    "tpu.trace_stop"() : () -> ()
    %241 = vector.extract_strided_slice %200 {offsets = [0, 16], sizes = [16, 8], strides = [1, 1]} : vector<16x96xf32> to vector<16x8xf32>
    %242 = vector.shape_cast %241 : vector<16x8xf32> to vector<2x8x8xf32>
    %243 = vector.extract_strided_slice %200 {offsets = [0, 48], sizes = [16, 8], strides = [1, 1]} : vector<16x96xf32> to vector<16x8xf32>
    %244 = vector.shape_cast %243 : vector<16x8xf32> to vector<2x8x8xf32>
    %245 = vector.extract_strided_slice %200 {offsets = [0, 80], sizes = [16, 8], strides = [1, 1]} : vector<16x96xf32> to vector<16x8xf32>
    %246 = vector.shape_cast %245 : vector<16x8xf32> to vector<2x8x8xf32>
    "tpu.trace_start"() <{level = 10 : i32, message = "bqd,bkd->bqk"}> : () -> ()
    %cst_75 = arith.constant dense<0.000000e+00> : vector<2x8x8xf32>
    %247 = tpu.matmul %242, %244, %cst_75 {dimension_numbers = #tpu.dot_dimension_numbers<[2], [2], [1], [1], [0, 0, 0, 1, 1, 1], [0], [0]>} : vector<2x8x8xf32>, vector<2x8x8xf32>, vector<2x8x8xf32> -> vector<2x8x8xf32>
    "tpu.trace_stop"() : () -> ()
    %cst_76 = arith.constant 0.353553385 : f32
    %248 = vector.broadcast %cst_76 : f32 to vector<2x8x8xf32>
    %249 = arith.mulf %247, %248 : vector<2x8x8xf32>
    %cst_77 = arith.constant dense<0xFF800000> : vector<2x8xf32>
    %250 = vector.multi_reduction <maximumf>, %249, %cst_77 [2] : vector<2x8x8xf32> to vector<2x8xf32>
    %251 = vector.shape_cast %250 : vector<2x8xf32> to vector<2x8x1xf32>
    %252 = vector.broadcast %251 : vector<2x8x1xf32> to vector<2x8x8xf32>
    %253 = arith.subf %249, %252 : vector<2x8x8xf32>
    %254 = math.exp %253 : vector<2x8x8xf32>
    %cst_78 = arith.constant dense<0.000000e+00> : vector<2x8xf32>
    %255 = vector.multi_reduction <add>, %254, %cst_78 [2] : vector<2x8x8xf32> to vector<2x8xf32>
    %256 = vector.shape_cast %255 : vector<2x8xf32> to vector<2x8x1xf32>
    %257 = tpu.reciprocal %256 {approx = true} : vector<2x8x1xf32> -> vector<2x8x1xf32>
    %258 = vector.broadcast %257 : vector<2x8x1xf32> to vector<2x8x8xf32>
    %259 = arith.mulf %254, %258 : vector<2x8x8xf32>
    "tpu.trace_start"() <{level = 10 : i32, message = "bqk,bkd->bqd"}> : () -> ()
    %cst_79 = arith.constant dense<0.000000e+00> : vector<2x8x8xf32>
    %260 = tpu.matmul %259, %246, %cst_79 {dimension_numbers = #tpu.dot_dimension_numbers<[2], [1], [1], [2], [0, 0, 0, 1, 1, 2], [0], [0]>} : vector<2x8x8xf32>, vector<2x8x8xf32>, vector<2x8x8xf32> -> vector<2x8x8xf32>
    "tpu.trace_stop"() : () -> ()
    %261 = vector.extract_strided_slice %200 {offsets = [0, 24], sizes = [16, 8], strides = [1, 1]} : vector<16x96xf32> to vector<16x8xf32>
    %262 = vector.shape_cast %261 : vector<16x8xf32> to vector<2x8x8xf32>
    %263 = vector.extract_strided_slice %200 {offsets = [0, 56], sizes = [16, 8], strides = [1, 1]} : vector<16x96xf32> to vector<16x8xf32>
    %264 = vector.shape_cast %263 : vector<16x8xf32> to vector<2x8x8xf32>
    %265 = vector.extract_strided_slice %200 {offsets = [0, 88], sizes = [16, 8], strides = [1, 1]} : vector<16x96xf32> to vector<16x8xf32>
    %266 = vector.shape_cast %265 : vector<16x8xf32> to vector<2x8x8xf32>
    "tpu.trace_start"() <{level = 10 : i32, message = "bqd,bkd->bqk"}> : () -> ()
    %cst_80 = arith.constant dense<0.000000e+00> : vector<2x8x8xf32>
    %267 = tpu.matmul %262, %264, %cst_80 {dimension_numbers = #tpu.dot_dimension_numbers<[2], [2], [1], [1], [0, 0, 0, 1, 1, 1], [0], [0]>} : vector<2x8x8xf32>, vector<2x8x8xf32>, vector<2x8x8xf32> -> vector<2x8x8xf32>
    "tpu.trace_stop"() : () -> ()
    %cst_81 = arith.constant 0.353553385 : f32
    %268 = vector.broadcast %cst_81 : f32 to vector<2x8x8xf32>
    %269 = arith.mulf %267, %268 : vector<2x8x8xf32>
    %cst_82 = arith.constant dense<0xFF800000> : vector<2x8xf32>
    %270 = vector.multi_reduction <maximumf>, %269, %cst_82 [2] : vector<2x8x8xf32> to vector<2x8xf32>
    %271 = vector.shape_cast %270 : vector<2x8xf32> to vector<2x8x1xf32>
    %272 = vector.broadcast %271 : vector<2x8x1xf32> to vector<2x8x8xf32>
    %273 = arith.subf %269, %272 : vector<2x8x8xf32>
    %274 = math.exp %273 : vector<2x8x8xf32>
    %cst_83 = arith.constant dense<0.000000e+00> : vector<2x8xf32>
    %275 = vector.multi_reduction <add>, %274, %cst_83 [2] : vector<2x8x8xf32> to vector<2x8xf32>
    %276 = vector.shape_cast %275 : vector<2x8xf32> to vector<2x8x1xf32>
    %277 = tpu.reciprocal %276 {approx = true} : vector<2x8x1xf32> -> vector<2x8x1xf32>
    %278 = vector.broadcast %277 : vector<2x8x1xf32> to vector<2x8x8xf32>
    %279 = arith.mulf %274, %278 : vector<2x8x8xf32>
    "tpu.trace_start"() <{level = 10 : i32, message = "bqk,bkd->bqd"}> : () -> ()
    %cst_84 = arith.constant dense<0.000000e+00> : vector<2x8x8xf32>
    %280 = tpu.matmul %279, %266, %cst_84 {dimension_numbers = #tpu.dot_dimension_numbers<[2], [1], [1], [2], [0, 0, 0, 1, 1, 2], [0], [0]>} : vector<2x8x8xf32>, vector<2x8x8xf32>, vector<2x8x8xf32> -> vector<2x8x8xf32>
    "tpu.trace_stop"() : () -> ()
    %281 = tpu.concatenate %220, %240, %260, %280 in 2 : vector<2x8x8xf32>, vector<2x8x8xf32>, vector<2x8x8xf32>, vector<2x8x8xf32> -> vector<2x8x32xf32>
    %282 = vector.shape_cast %281 : vector<2x8x32xf32> to vector<16x32xf32>
    %cst_85 = arith.constant dense<0.000000e+00> : vector<16x32xf32>
    %283 = tpu.matmul %282, %198, %cst_85 {dimension_numbers = #tpu.dot_dimension_numbers<[1], [0], [0], [1], [0, 0, 1, 1], [], []>} : vector<16x32xf32>, vector<32x32xf32>, vector<16x32xf32> -> vector<16x32xf32>
    %284 = vector.broadcast %191 : vector<1x32xf32> to vector<16x32xf32>
    %285 = arith.addf %283, %284 : vector<16x32xf32>
    %286 = arith.addf %285, %182 : vector<16x32xf32>
    %cst_86 = arith.constant dense<0.000000e+00> : vector<16xf32>
    %287 = vector.multi_reduction <add>, %286, %cst_86 [1] : vector<16x32xf32> to vector<16xf32>
    %288 = vector.shape_cast %287 : vector<16xf32> to vector<16x1xf32>
    %cst_87 = arith.constant 3.200000e+01 : f32
    %289 = vector.broadcast %cst_87 : f32 to vector<16x1xf32>
    %290 = arith.divf %288, %289 : vector<16x1xf32>
    %291 = vector.broadcast %290 : vector<16x1xf32> to vector<16x32xf32>
    %292 = arith.subf %286, %291 : vector<16x32xf32>
    %293 = arith.mulf %292, %292 : vector<16x32xf32>
    %cst_88 = arith.constant dense<0.000000e+00> : vector<16xf32>
    %294 = vector.multi_reduction <add>, %293, %cst_88 [1] : vector<16x32xf32> to vector<16xf32>
    %295 = vector.shape_cast %294 : vector<16xf32> to vector<16x1xf32>
    %cst_89 = arith.constant 3.200000e+01 : f32
    %296 = vector.broadcast %cst_89 : f32 to vector<16x1xf32>
    %297 = arith.divf %295, %296 : vector<16x1xf32>
    %cst_90 = arith.constant 9.99999974E-6 : f32
    %298 = vector.broadcast %cst_90 : f32 to vector<16x1xf32>
    %299 = arith.addf %297, %298 : vector<16x1xf32>
    %300 = math.rsqrt %299 : vector<16x1xf32>
    %301 = vector.broadcast %300 : vector<16x1xf32> to vector<16x32xf32>
    %302 = arith.mulf %292, %301 : vector<16x32xf32>
    %303 = vector.broadcast %192 : vector<1x32xf32> to vector<16x32xf32>
    %304 = arith.mulf %302, %303 : vector<16x32xf32>
    %305 = vector.broadcast %193 : vector<1x32xf32> to vector<16x32xf32>
    %306 = arith.addf %304, %305 : vector<16x32xf32>
    %cst_91 = arith.constant dense<0.000000e+00> : vector<16x128xf32>
    %307 = tpu.matmul %306, %186, %cst_91 {dimension_numbers = #tpu.dot_dimension_numbers<[1], [0], [0], [1], [0, 0, 1, 1], [], []>} : vector<16x32xf32>, vector<32x128xf32>, vector<16x128xf32> -> vector<16x128xf32>
    %308 = vector.broadcast %194 : vector<1x128xf32> to vector<16x128xf32>
    %309 = arith.addf %307, %308 : vector<16x128xf32>
    %cst_92 = arith.constant 0.000000e+00 : f32
    %310 = vector.broadcast %cst_92 : f32 to vector<16x128xf32>
    %311 = arith.maximumf %309, %310 : vector<16x128xf32>
    %cst_93 = arith.constant dense<0.000000e+00> : vector<16x32xf32>
    %312 = tpu.matmul %311, %188, %cst_93 {dimension_numbers = #tpu.dot_dimension_numbers<[1], [0], [0], [1], [0, 0, 1, 1], [], []>} : vector<16x128xf32>, vector<128x32xf32>, vector<16x32xf32> -> vector<16x32xf32>
    %313 = vector.broadcast %195 : vector<1x32xf32> to vector<16x32xf32>
    %314 = arith.addf %312, %313 : vector<16x32xf32>
    %315 = arith.addf %314, %306 : vector<16x32xf32>
    %cst_94 = arith.constant dense<0.000000e+00> : vector<16xf32>
    %316 = vector.multi_reduction <add>, %315, %cst_94 [1] : vector<16x32xf32> to vector<16xf32>
    %317 = vector.shape_cast %316 : vector<16xf32> to vector<16x1xf32>
    %cst_95 = arith.constant 3.200000e+01 : f32
    %318 = vector.broadcast %cst_95 : f32 to vector<16x1xf32>
    %319 = arith.divf %317, %318 : vector<16x1xf32>
    %320 = vector.broadcast %319 : vector<16x1xf32> to vector<16x32xf32>
    %321 = arith.subf %315, %320 : vector<16x32xf32>
    %322 = arith.mulf %321, %321 : vector<16x32xf32>
    %cst_96 = arith.constant dense<0.000000e+00> : vector<16xf32>
    %323 = vector.multi_reduction <add>, %322, %cst_96 [1] : vector<16x32xf32> to vector<16xf32>
    %324 = vector.shape_cast %323 : vector<16xf32> to vector<16x1xf32>
    %cst_97 = arith.constant 3.200000e+01 : f32
    %325 = vector.broadcast %cst_97 : f32 to vector<16x1xf32>
    %326 = arith.divf %324, %325 : vector<16x1xf32>
    %cst_98 = arith.constant 9.99999974E-6 : f32
    %327 = vector.broadcast %cst_98 : f32 to vector<16x1xf32>
    %328 = arith.addf %326, %327 : vector<16x1xf32>
    %329 = math.rsqrt %328 : vector<16x1xf32>
    %330 = vector.broadcast %329 : vector<16x1xf32> to vector<16x32xf32>
    %331 = arith.mulf %321, %330 : vector<16x32xf32>
    %332 = vector.broadcast %196 : vector<1x32xf32> to vector<16x32xf32>
    %333 = arith.mulf %331, %332 : vector<16x32xf32>
    %334 = vector.broadcast %197 : vector<1x32xf32> to vector<16x32xf32>
    %335 = arith.addf %333, %334 : vector<16x32xf32>
    %c0_99 = arith.constant 0 : index
    %c0_100 = arith.constant 0 : index
    %336 = vector.load %arg6[%c0_99, %c0_100] : memref<16x32xf32, #tpu.memory_space<vmem>>, vector<16x32xf32>
    tpu.vector_store %arg6[%c0_99, %c0_100], %335 {strides = array<i32>} : memref<16x32xf32, #tpu.memory_space<vmem>>, vector<16x32xf32>,
    return
  }
}

</mosaic_0001>

<bundles_post_ra>
// kernel: transformer_encoder.1
= control target key start
LH: loop header
LB: loop body
LE: loop exit
PB: predicated region body
PF: predicated region fallthrough
CT: control target
= control target key end

     0   :  { %vm89_vm0 = vcmask 1041408   ;;  %v4490_v2 = vmov 0   ;;  %v4491_v6 = vmov 0.0   ;;  %s5229_s0 = inlined_call_operand.vmem [shape: s32[16,1], index: 0, kind: input, shape index: {}]   ;;  %s5230_s1 = inlined_call_operand.vmem [shape: f32[66,32], index: 1, kind: input, shape index: {}]   ;;  %s5231_s2 = inlined_call_operand.vmem [shape: f32[2,32,128], index: 2, kind: input, shape index: {}]   ;;  %s5232_s3 = inlined_call_operand.vmem [shape: f32[2,32,128], index: 3, kind: input, shape index: {}]   ;;  %s5233_s4 = inlined_call_operand.vmem [shape: f32[2,128,32], index: 4, kind: input, shape index: {}]   ;;  %s5234_s5 = inlined_call_operand.vmem [shape: f32[2,7,128], index: 5, kind: input, shape index: {}]   ;;  %s5235_s6 = inlined_call_operand.hbm [shape: f32[16,32], index: 6, kind: output, shape index: {}]  }
   0x1   :  { %v24_v0 = vld [vmem:[%s5229_s0] sm:$0xff]  ;;  %4387 = vset.pattern.permute.xlu0 %v4490_v2  ;;  %v80_v3 = vld [vmem:[%s5230_s1 + $0x38] sm:$0xff]  ;;  %v79_v4 = vld [vmem:[%s5230_s1 + $0x30] sm:$0xff]  ;;  %4082 = vmatprep.subr.mxu1 %v4491_v6 }
   0x2   :  { %v81_v1 = vld [vmem:[%s5230_s1 + $0x40] sm:$0x3]  ;;  %58 = vperm.xlu0 %4387, %v24_v0   ;;  %v25_v5 = vld [vmem:[%s5229_s0 + $0x8] sm:$0xff] }
   0x3   :  { %4050 = vmatprep.subr.msk.mxu0 %vm89_vm0, %v81_v1 }
   0x4   :  { %4051 = vmatpush3.msk.msra.mxu0 %vm89_vm0, %v81_v1 }
   0x5   :  { %4052 = vmatprep.subr.mxu0 %v80_v3 }
   0x6   :  { %11 = vsyncpa [#allocation3], 0  ;;  %4053 = vmatpush3.msra.mxu0 %v80_v3  ;;  %v78_v7 = vld [vmem:[%s5230_s1 + $0x28] sm:$0xff]  ;;  %61 = vperm.xlu0 %4387, %v25_v5   ;;  %v77_v8 = vld [vmem:[%s5230_s1 + $0x20] sm:$0xff]  ;;  %v26_v14 = vlaneseq  ;;  %vm82_vm3 = vcmask 539648   ;;  %vm193_vm8 = vcmask 261120  }
   0x7   :  { %4054 = vmatprep.subr.mxu0 %v79_v4  ;;  %v76_v9 = vld [vmem:[%s5230_s1 + $0x18] sm:$0xff]  ;;  %v75_v10 = vld [vmem:[%s5230_s1 + $0x10] sm:$0xff]  ;;  %v74_v11 = vld [vmem:[%s5230_s1 + $0x8] sm:$0xff]  ;;  %vm4492_vm9 = vmmov 0   ;;  %s4493_s25 = smov 96   ;;  %vm278_vm10 = vcmask 64512  }
   0x8   :  { %4055 = vmatpush3.msra.mxu0 %v79_v4  ;;  %v73_v12 = vld [vmem:[%s5230_s1] sm:$0xff]  ;;  %v4582_v13 = vld [vmem:[%s5231_s2 + $0x18] sm:$0xff]  ;;  %v4585_v15 = vshrl.u32 %v26_v14, 7  ;;  %v27_v18 = vand.u32 127, %v26_v14  ;;  %v4594_v26 = vld [vmem:[%s5231_s2 + $0x10] sm:$0xff]  ;;  %4084 = vmatprep.mubr.msk.f32.mxu1 %vm4492_vm9, %v4491_v6  ;;  %s4494_s26 = smov 64  }
   0x9   :  { %4056 = vmatprep.subr.mxu0 %v78_v7  ;;  %v4602_v27 = vld [vmem:[%s5231_s2 + $0x8] sm:$0xff]  ;;  %v4609_v28 = vld [vmem:[%s5231_s2] sm:$0xff]  ;;  %s4495_s27 = smov 88   ;;  %s4496_s28 = smov 120   ;;  %vm1628_vm11 = vcmask 130048   ;;  %vm1631_vm12 = vcmask 195584  }
   0xa   :  { %4057 = vmatpush3.msra.mxu0 %v78_v7  ;;  %v35_v16 = vand.u32 7, %v4585_v15  ;;  %v30_v17 = vadd.s32 8, %v4585_v15  ;;  %s4497_s29 = smov 56   ;;  %s4498_s30 = smov 80  }
   0xb   :  { %4058 = vmatprep.subr.mxu0 %v77_v8  ;;  %s4499_s7 = smov 112   ;;  %s4500_s8 = smov 48  }
   0xc   :  { %4059 = vmatpush3.msra.mxu0 %v77_v8  ;;  %v55_v19 = vadd.s32 50, %v35_v16  ;;  %v42_v20 = vand.u32 7, %v30_v17  ;;  %s4501_s9 = smov 72   ;;  %s4502_s10 = smov 104  }
   0xd   :  { %4060 = vmatprep.subr.mxu0 %v76_v9  ;;  %s4503_s0 = smov 40   ;;  %s4504_s11 = smov 32  }
   0xe   :  { %4061 = vmatpush3.msra.mxu0 %v76_v9  ;;  %vm65_vm1 = vcmp.eq.s32.totalorder %v27_v18, %v55_v19  ;;  %v56_v21 = vadd.s32 50, %v42_v20  ;;  %s4505_s12 = smov 16   ;;  %s4506_s13 = smov 8  }
   0xf   :  { %4062 = vmatprep.subr.mxu0 %v75_v10  ;;  %s4507_s14 = smov 24  }
  0x10   :  { %4063 = vmatpush3.msra.mxu0 %v75_v10  ;;  %vm66_vm5 = vcmp.eq.s32.totalorder %v27_v18, %v56_v21 }
  0x11   :  { %4064 = vmatprep.subr.mxu0 %v74_v11 }
  0x12   :  { %4065 = vmatpush3.msra.mxu0 %v74_v11 }
  0x13   :  { %4066 = vmatprep.subr.mxu0 %v73_v12 }
  0x14   :  { %4067 = vmatpush3.msra.mxu0 %v73_v12 }
  0x15   :  { %4071 = vmatprep.subr.mxu0 %v4582_v13 }
  0x7d   :  { %v59_v22 = vpop.permute.xlu0 %58 }
  0x7e   :  { %vm63_vm2 = vcmp.eq.s32.totalorder %v27_v18, %v59_v22 }
  0x7f   :  { %vm67_vm4 = vmor %vm63_vm2, %vm65_vm1 }
  0x80   :  { %v3813_v23 = vsel %vm67_vm4, 1.0, %v4491_v6 }
  0x81   :  { %4068 = vmatprep.mubr.msk.f32.mxu0 %vm82_vm3, %v3813_v23  ;;  %v62_v24 = vpop.permute.xlu0 %61 }
  0x82   :  { %vm64_vm6 = vcmp.eq.s32.totalorder %v27_v18, %v62_v24 }
  0x83   :  { %vm68_vm7 = vmor %vm64_vm6, %vm66_vm5 }
  0x84   :  { %v3814_v25 = vsel %vm68_vm7, 1.0, %v4491_v6 }
  0x85   :  { %4069 = vmatmul.mubr.msk.f32.vlgmr.msra.gmra.mxu0 %vm82_vm3, %v3814_v25 }
  0x86   :  { %4072 = vmatpush3.msra.mxu0 %v4582_v13 }
  0x87   :  { %4073 = vmatprep.subr.mxu0 %v4594_v26 }
  0x88   :  { %4074 = vmatpush3.msra.mxu0 %v4594_v26 }
  0x89   :  { %4075 = vmatprep.subr.mxu0 %v4602_v27 }
  0x8a   :  { %4076 = vmatpush3.msra.mxu0 %v4602_v27 }
  0x8b   :  { %4077 = vmatprep.subr.mxu0 %v4609_v28 }
  0x8c   :  { %4078 = vmatpush3.msra.mxu0 %v4609_v28 }
  0x8d   :  { %4097 = vmatprep.subr.mxu0 %v4491_v6 }
 0x145   :  { %v4614_v29 = vpop.f32.mrf.mxu0 }
 0x147   :  { %v4616_v30 = vpop.f32.mrf.mxu0 }
 0x148   :  { %4079 = vmatprep.mubr.msk.f32.mxu0 %vm193_vm8, %v4616_v30 }
 0x149   :  { %4080 = vmatmul.mubr.msk.f32.vlgmr.msra.gmra.mxu0 %vm193_vm8, %v4614_v29 }
 0x14a   :  { %4099 = vmatprep.mubr.msk.f32.mxu0 %vm4492_vm9, %v4491_v6 }
 0x209   :  { %v4626_v31 = vpop.f32.mrf.mxu0 }
 0x20b   :  { %v4628_v32 = vpop.f32.mrf.mxu0 }
 0x20c   :  { %276 = vrot.lane.b32.xlu1 %v4628_v32, %s4493_s25 }
 0x210   :  { %354 = vrot.lane.b32.xlu1 %v4626_v31, %s4493_s25 }
 0x27e   :  { %v277_v33 = vpop.permute.xlu1 %276 }
 0x27f   :  { %4083 = vmatpush3.xpose.msk.msra.mxu1 %vm278_vm10, %v277_v33 }
 0x280   :  { %4087 = vmatprep.subr.mxu1 %v4491_v6 }
 0x282   :  { %4085 = vmatmul.mubr.msk.f32.vlgmr.msra.gmra.mxu1 %vm278_vm10, %v4628_v32  ;;  %v355_v34 = vpop.permute.xlu1 %354 }
 0x283   :  { %4088 = vmatpush3.xpose.msk.msra.mxu1 %vm278_vm10, %v355_v34  ;;  %4089 = vmatprep.mubr.msk.f32.mxu1 %vm4492_vm9, %v4491_v6 }
 0x284   :  { %4092 = vmatprep.subr.mxu1 %v4491_v6 }
 0x286   :  { %4090 = vmatmul.mubr.msk.f32.vlgmr.msra.gmra.mxu1 %vm278_vm10, %v4626_v31 }
 0x287   :  { %4094 = vmatprep.mubr.msk.f32.mxu1 %vm4492_vm9, %v4491_v6 }
 0x342   :  { %v349_v35 = vpop.f32.mrf.mxu1 }
 0x343   :  { %v430_v36 = vmul.f32 0.35355338, %v349_v35 }
 0x344   :  { %v4086_v37 = vpop.f32.mrf.mxu1 }
 0x345   :  { %v432_v38 = vsel %vm278_vm10, %v430_v36, -inf }
 0x346   :  { %433 = vmax.xlane.f32.xlu0 %v432_v38  ;;  %v426_v39 = vpop.f32.mrf.mxu1 }
 0x347   :  { %v431_v40 = vmul.f32 0.35355338, %v426_v39 }
 0x348   :  { %v4091_v41 = vpop.f32.mrf.mxu1 }
 0x349   :  { %v435_v42 = vsel %vm278_vm10, %v431_v40, -inf }
 0x34a   :  { %436 = vmax.xlane.f32.xlu1 %v435_v42 }
 0x35b   :  { %454 = vrot.lane.b32.xlu1 %v4628_v32, %s4494_s26 }
 0x35c   :  { %530 = vrot.lane.b32.xlu0 %v4626_v31, %s4494_s26 }
 0x35f   :  { %608 = vrot.lane.b32.xlu1 %v4628_v32, %s4495_s27 }
 0x363   :  { %686 = vrot.lane.b32.xlu1 %v4626_v31, %s4495_s27 }
 0x367   :  { %684 = vrot.lane.b32.xlu1 %v4626_v31, %s4496_s28 }
 0x3cf   :  { %v434_v43 = vpop.xlane.xlu0 %433 }
 0x3d0   :  { %v438_v44 = vsub.f32 %v430_v36, %v434_v43 }
 0x3d2   :  { %v440_v45 = vmul.f32 1.442695, %v438_v44 }
 0x3d3   :  { %v531_v46 = vpop.permute.xlu0 %530  ;;  %v437_v47 = vpop.xlane.xlu1 %436 }
 0x3d4   :  { %4388 = vpow2.f32 %v440_v45  ;;  %v439_v48 = vsub.f32 %v431_v40, %v437_v47  ;;  %4098 = vmatpush3.msra.mxu0 %v531_v46 }
 0x3d5   :  { %4107 = vmatprep.subr.mxu0 %v4491_v6 }
 0x3d6   :  { %v442_v49 = vmul.f32 1.442695, %v439_v48 }
 0x3d7   :  { %v455_v50 = vpop.permute.xlu1 %454 }
 0x3d8   :  { %4390 = vpow2.f32 %v442_v49  ;;  %4093 = vmatpush3.msra.mxu1 %v455_v50 }
 0x3d9   :  { %4102 = vmatprep.subr.mxu1 %v4491_v6 }
 0x3db   :  { %v609_v57 = vpop.permute.xlu1 %608 }
 0x3df   :  { %v687_v61 = vpop.permute.xlu1 %686 }
 0x3e1   :  { %v4389_v51 = vpop.eup %4388 }
 0x3e2   :  { %v444_v52 = vsel %vm278_vm10, %v4389_v51, 0.0 }
 0x3e3   :  { %445 = vadd.xlane.f32.xlu0 %v444_v52  ;;  %v685_v0 = vpop.permute.xlu1 %684 }
 0x3e5   :  { %v4391_v53 = vpop.eup %4390 }
 0x3e6   :  { %v447_v54 = vsel %vm278_vm10, %v4391_v53, 0.0 }
 0x3e7   :  { %448 = vadd.xlane.f32.xlu0 %v447_v54 }
 0x3fd   :  { %606 = vrot.lane.b32.xlu0 %v4628_v32, %s4496_s28 }
 0x46c   :  { %v446_v55 = vpop.xlane.xlu0 %445 }
 0x46d   :  { %4392 = vrcp.f32 %v446_v55 }
 0x470   :  { %v449_v56 = vpop.xlane.xlu0 %448 }
 0x471   :  { %4394 = vrcp.f32 %v449_v56 }
 0x474   :  { %v607_v63 = vpop.permute.xlu0 %606 }
 0x47a   :  { %v4393_v58 = vpop.eup %4392 }
 0x47b   :  { %v452_v59 = vmul.f32 %v4393_v58, %v4389_v51 }
 0x47d   :  { %4095 = vmatmul.mubr.msk.f32.vlgmr.msra.gmra.mxu1 %vm278_vm10, %v452_v59 }
 0x47e   :  { %v4395_v60 = vpop.eup %4394  ;;  %4103 = vmatpush3.xpose.msk.msra.mxu1 %vm278_vm10, %v609_v57  ;;  %4104 = vmatprep.mubr.msk.f32.mxu1 %vm4492_vm9, %v4491_v6 }
 0x47f   :  { %v453_v62 = vmul.f32 %v4395_v60, %v4391_v53  ;;  %4112 = vmatprep.subr.mxu1 %v4491_v6 }
 0x481   :  { %4100 = vmatmul.mubr.msk.f32.vlgmr.msra.gmra.mxu0 %vm278_vm10, %v453_v62  ;;  %4105 = vmatmul.mubr.msk.f32.vlgmr.msra.gmra.mxu1 %vm278_vm10, %v607_v63 }
 0x482   :  { %4108 = vmatpush3.xpose.msk.msra.mxu0 %vm278_vm10, %v687_v61  ;;  %4109 = vmatprep.mubr.msk.f32.mxu0 %vm4492_vm9, %v4491_v6 }
 0x483   :  { %4117 = vmatprep.subr.mxu0 %v4491_v6  ;;  %4114 = vmatprep.mubr.msk.f32.mxu1 %vm4492_vm9, %v4491_v6 }
 0x485   :  { %4110 = vmatmul.mubr.msk.f32.vlgmr.msra.gmra.mxu0 %vm278_vm10, %v685_v0 }
 0x486   :  { %4119 = vmatprep.mubr.msk.f32.mxu0 %vm4492_vm9, %v4491_v6 }
 0x53d   :  { %v4680_v1 = vpop.f32.mrf.mxu1 }
 0x53f   :  { %v4096_v2 = vpop.f32.mrf.mxu1 }
 0x541   :  { %v4682_v3 = vpop.f32.mrf.mxu0  ;;  %v680_v4 = vpop.f32.mrf.mxu1 }
 0x542   :  { %v762_v5 = vmul.f32 0.35355338, %v680_v4 }
 0x543   :  { %v4101_v7 = vpop.f32.mrf.mxu0  ;;  %v4106_v8 = vpop.f32.mrf.mxu1 }
 0x544   :  { %v764_v9 = vsel %vm278_vm10, %v762_v5, -inf }
 0x545   :  { %v758_v10 = vpop.f32.mrf.mxu0  ;;  %765 = vmax.xlane.f32.xlu0 %v764_v9 }
 0x546   :  { %v763_v11 = vmul.f32 0.35355338, %v758_v10 }
 0x547   :  { %v4111_v12 = vpop.f32.mrf.mxu0 }
 0x548   :  { %v767_v14 = vsel %vm278_vm10, %v763_v11, -inf }
 0x549   :  { %768 = vmax.xlane.f32.xlu1 %v767_v14 }
 0x55a   :  { %786 = vrot.lane.b32.xlu1 %v4628_v32, %s4497_s29 }
 0x55b   :  { %862 = vrot.lane.b32.xlu0 %v4626_v31, %s4497_s29 }
 0x55e   :  { %940 = vrot.lane.b32.xlu1 %v4628_v32, %s4498_s30 }
 0x562   :  { %1018 = vrot.lane.b32.xlu1 %v4626_v31, %s4498_s30 }
 0x566   :  { %1016 = vrot.lane.b32.xlu1 %v4626_v31, %s4499_s7 }
 0x5ce   :  { %v766_v16 = vpop.xlane.xlu0 %765 }
 0x5cf   :  { %v770_v17 = vsub.f32 %v762_v5, %v766_v16 }
 0x5d1   :  { %v772_v18 = vmul.f32 1.442695, %v770_v17 }
 0x5d2   :  { %v769_v19 = vpop.xlane.xlu1 %768  ;;  %v863_v20 = vpop.permute.xlu0 %862 }
 0x5d3   :  { %4396 = vpow2.f32 %v772_v18  ;;  %v771_v21 = vsub.f32 %v763_v11, %v769_v19  ;;  %4118 = vmatpush3.msra.mxu0 %v863_v20 }
 0x5d4   :  { %4127 = vmatprep.subr.mxu0 %v4491_v6 }
 0x5d5   :  { %v774_v22 = vmul.f32 1.442695, %v771_v21 }
 0x5d6   :  { %v787_v23 = vpop.permute.xlu1 %786 }
 0x5d7   :  { %4398 = vpow2.f32 %v774_v22  ;;  %4113 = vmatpush3.msra.mxu1 %v787_v23 }
 0x5d8   :  { %4122 = vmatprep.subr.mxu1 %v4491_v6 }
 0x5da   :  { %v941_v37 = vpop.permute.xlu1 %940 }
 0x5de   :  { %v1019_v41 = vpop.permute.xlu1 %1018 }
 0x5e0   :  { %v4397_v24 = vpop.eup %4396 }
 0x5e1   :  { %v776_v25 = vsel %vm278_vm10, %v4397_v24, 0.0 }
 0x5e2   :  { %777 = vadd.xlane.f32.xlu0 %v776_v25  ;;  %v1017_v44 = vpop.permute.xlu1 %1016 }
 0x5e4   :  { %v4399_v33 = vpop.eup %4398 }
 0x5e5   :  { %v779_v34 = vsel %vm278_vm10, %v4399_v33, 0.0 }
 0x5e6   :  { %780 = vadd.xlane.f32.xlu0 %v779_v34 }
 0x5fc   :  { %938 = vrot.lane.b32.xlu0 %v4628_v32, %s4499_s7 }
 0x66b   :  { %v778_v35 = vpop.xlane.xlu0 %777 }
 0x66c   :  { %4400 = vrcp.f32 %v778_v35 }
 0x66f   :  { %v781_v36 = vpop.xlane.xlu0 %780 }
 0x670   :  { %4402 = vrcp.f32 %v781_v36 }
 0x673   :  { %v939_v43 = vpop.permute.xlu0 %938 }
 0x679   :  { %v4401_v38 = vpop.eup %4400 }
 0x67a   :  { %v784_v39 = vmul.f32 %v4401_v38, %v4397_v24 }
 0x67c   :  { %4115 = vmatmul.mubr.msk.f32.vlgmr.msra.gmra.mxu1 %vm278_vm10, %v784_v39 }
 0x67d   :  { %v4403_v40 = vpop.eup %4402  ;;  %4123 = vmatpush3.xpose.msk.msra.mxu1 %vm278_vm10, %v941_v37  ;;  %4124 = vmatprep.mubr.msk.f32.mxu1 %vm4492_vm9, %v4491_v6 }
 0x67e   :  { %v785_v42 = vmul.f32 %v4403_v40, %v4399_v33  ;;  %4132 = vmatprep.subr.mxu1 %v4491_v6 }
 0x680   :  { %4120 = vmatmul.mubr.msk.f32.vlgmr.msra.gmra.mxu0 %vm278_vm10, %v785_v42  ;;  %4125 = vmatmul.mubr.msk.f32.vlgmr.msra.gmra.mxu1 %vm278_vm10, %v939_v43 }
 0x681   :  { %4128 = vmatpush3.xpose.msk.msra.mxu0 %vm278_vm10, %v1019_v41  ;;  %4129 = vmatprep.mubr.msk.f32.mxu0 %vm4492_vm9, %v4491_v6 }
 0x682   :  { %4137 = vmatprep.subr.mxu0 %v4491_v6  ;;  %4134 = vmatprep.mubr.msk.f32.mxu1 %vm4492_vm9, %v4491_v6 }
 0x684   :  { %4130 = vmatmul.mubr.msk.f32.vlgmr.msra.gmra.mxu0 %vm278_vm10, %v1017_v44 }
 0x685   :  { %4139 = vmatprep.mubr.msk.f32.mxu0 %vm4492_vm9, %v4491_v6 }
 0x73c   :  { %v4718_v45 = vpop.f32.mrf.mxu1 }
 0x73e   :  { %v4116_v46 = vpop.f32.mrf.mxu1 }
 0x740   :  { %v4720_v47 = vpop.f32.mrf.mxu0  ;;  %v1012_v48 = vpop.f32.mrf.mxu1 }
 0x741   :  { %v1094_v49 = vmul.f32 0.35355338, %v1012_v48 }
 0x742   :  { %v4121_v50 = vpop.f32.mrf.mxu0  ;;  %v4126_v51 = vpop.f32.mrf.mxu1 }
 0x743   :  { %v1096_v52 = vsel %vm278_vm10, %v1094_v49, -inf }
 0x744   :  { %v1090_v53 = vpop.f32.mrf.mxu0  ;;  %1097 = vmax.xlane.f32.xlu0 %v1096_v52 }
 0x745   :  { %v1095_v54 = vmul.f32 0.35355338, %v1090_v53 }
 0x746   :  { %v4131_v55 = vpop.f32.mrf.mxu0 }
 0x747   :  { %v1099_v56 = vsel %vm278_vm10, %v1095_v54, -inf }
 0x748   :  { %1100 = vmax.xlane.f32.xlu1 %v1099_v56 }
 0x759   :  { %1118 = vrot.lane.b32.xlu1 %v4628_v32, %s4500_s8 }
 0x75a   :  { %1194 = vrot.lane.b32.xlu0 %v4626_v31, %s4500_s8 }
 0x75d   :  { %1272 = vrot.lane.b32.xlu1 %v4628_v32, %s4501_s9 }
 0x761   :  { %1350 = vrot.lane.b32.xlu1 %v4626_v31, %s4501_s9 }
 0x765   :  { %1348 = vrot.lane.b32.xlu1 %v4626_v31, %s4502_s10 }
 0x7cd   :  { %v1098_v57 = vpop.xlane.xlu0 %1097 }
 0x7ce   :  { %v1102_v58 = vsub.f32 %v1094_v49, %v1098_v57 }
 0x7d0   :  { %v1104_v59 = vmul.f32 1.442695, %v1102_v58 }
 0x7d1   :  { %v1101_v60 = vpop.xlane.xlu1 %1100  ;;  %v1195_v61 = vpop.permute.xlu0 %1194 }
 0x7d2   :  { %4404 = vpow2.f32 %v1104_v59  ;;  %v1103_v62 = vsub.f32 %v1095_v54, %v1101_v60  ;;  %4138 = vmatpush3.msra.mxu0 %v1195_v61 }
 0x7d3   :  { %4147 = vmatprep.subr.mxu0 %v4491_v6 }
 0x7d4   :  { %v1106_v63 = vmul.f32 1.442695, %v1103_v62 }
 0x7d5   :  { %v1119_v0 = vpop.permute.xlu1 %1118 }
 0x7d6   :  { %4406 = vpow2.f32 %v1106_v63  ;;  %4133 = vmatpush3.msra.mxu1 %v1119_v0 }
 0x7d7   :  { %4142 = vmatprep.subr.mxu1 %v4491_v6 }
 0x7d9   :  { %v1273_v10 = vpop.permute.xlu1 %1272 }
 0x7dd   :  { %v1351_v16 = vpop.permute.xlu1 %1350 }
 0x7df   :  { %v4405_v2 = vpop.eup %4404 }
 0x7e0   :  { %v1108_v4 = vsel %vm278_vm10, %v4405_v2, 0.0 }
 0x7e1   :  { %1109 = vadd.xlane.f32.xlu0 %v1108_v4  ;;  %v1349_v19 = vpop.permute.xlu1 %1348 }
 0x7e3   :  { %v4407_v5 = vpop.eup %4406 }
 0x7e4   :  { %v1111_v7 = vsel %vm278_vm10, %v4407_v5, 0.0 }
 0x7e5   :  { %1112 = vadd.xlane.f32.xlu0 %v1111_v7 }
 0x7fb   :  { %1270 = vrot.lane.b32.xlu0 %v4628_v32, %s4502_s10 }
 0x86a   :  { %v1110_v8 = vpop.xlane.xlu0 %1109 }
 0x86b   :  { %4408 = vrcp.f32 %v1110_v8 }
 0x86e   :  { %v1113_v9 = vpop.xlane.xlu0 %1112 }
 0x86f   :  { %4410 = vrcp.f32 %v1113_v9 }
 0x872   :  { %v1271_v18 = vpop.permute.xlu0 %1270 }
 0x878   :  { %v4409_v11 = vpop.eup %4408 }
 0x879   :  { %v1116_v12 = vmul.f32 %v4409_v11, %v4405_v2 }
 0x87b   :  { %4135 = vmatmul.mubr.msk.f32.vlgmr.msra.gmra.mxu1 %vm278_vm10, %v1116_v12 }
 0x87c   :  { %v4411_v14 = vpop.eup %4410  ;;  %4143 = vmatpush3.xpose.msk.msra.mxu1 %vm278_vm10, %v1273_v10  ;;  %4144 = vmatprep.mubr.msk.f32.mxu1 %vm4492_vm9, %v4491_v6  ;;  %v4796_v10 = vld [vmem:[%s5234_s5] sm:$0x7f] }
 0x87d   :  { %v1117_v17 = vmul.f32 %v4411_v14, %v4407_v5  ;;  %4152 = vmatprep.subr.mxu1 %v4491_v6 }
 0x87f   :  { %4140 = vmatmul.mubr.msk.f32.vlgmr.msra.gmra.mxu0 %vm278_vm10, %v1117_v17  ;;  %4145 = vmatmul.mubr.msk.f32.vlgmr.msra.gmra.mxu1 %vm278_vm10, %v1271_v18 }
 0x880   :  { %4148 = vmatpush3.xpose.msk.msra.mxu0 %vm278_vm10, %v1351_v16  ;;  %4149 = vmatprep.mubr.msk.f32.mxu0 %vm4492_vm9, %v4491_v6 }
 0x881   :  { %4157 = vmatprep.subr.mxu0 %v4491_v6  ;;  %4154 = vmatprep.mubr.msk.f32.mxu1 %vm4492_vm9, %v4491_v6 }
 0x883   :  { %4150 = vmatmul.mubr.msk.f32.vlgmr.msra.gmra.mxu0 %vm278_vm10, %v1349_v19 }
 0x884   :  { %4159 = vmatprep.mubr.msk.f32.mxu0 %vm4492_vm9, %v4491_v6 }
 0x93b   :  { %v1190_v20 = vpop.f32.mrf.mxu1 }
 0x93d   :  { %v4136_v21 = vpop.f32.mrf.mxu1 }
 0x93f   :  { %v1266_v22 = vpop.f32.mrf.mxu0  ;;  %v1344_v23 = vpop.f32.mrf.mxu1 }
 0x940   :  { %v1426_v24 = vmul.f32 0.35355338, %v1344_v23 }
 0x941   :  { %v4141_v25 = vpop.f32.mrf.mxu0  ;;  %v4146_v33 = vpop.f32.mrf.mxu1 }
 0x942   :  { %v1428_v34 = vsel %vm278_vm10, %v1426_v24, -inf }
 0x943   :  { %v1422_v35 = vpop.f32.mrf.mxu0  ;;  %1429 = vmax.xlane.f32.xlu0 %v1428_v34 }
 0x944   :  { %v1427_v36 = vmul.f32 0.35355338, %v1422_v35 }
 0x945   :  { %v4151_v37 = vpop.f32.mrf.mxu0 }
 0x946   :  { %v1431_v38 = vsel %vm278_vm10, %v1427_v36, -inf  ;;  %v174_v37 = vld [vmem:[%s5232_s3 + $0x10] sm:$0xff] }
 0x947   :  { %1432 = vmax.xlane.f32.xlu1 %v1431_v38  ;;  %v173_v38 = vld [vmem:[%s5232_s3 + $0x8] sm:$0xff] }
 0x958   :  { %1450 = vrot.lane.b32.xlu1 %v4628_v32, %s4503_s0 }
 0x95c   :  { %1648 = vrot.lane.b32.xlu1 %v4582_v13, %s4504_s11 }
 0x960   :  { %1646 = vrot.lane.b32.xlu1 %v4594_v26, %s4504_s11 }
 0x964   :  { %1644 = vrot.lane.b32.xlu1 %v4602_v27, %s4504_s11 }
 0x968   :  { %1612 = vrot.lane.b32.xlu1 %v1190_v20, %s4505_s12 }
 0x9cc   :  { %v1430_v39 = vpop.xlane.xlu0 %1429 }
 0x9cd   :  { %v1434_v40 = vsub.f32 %v1426_v24, %v1430_v39  ;;  %v172_v39 = vld [vmem:[%s5232_s3] sm:$0xff] }
 0x9cf   :  { %v1436_v41 = vmul.f32 1.442695, %v1434_v40  ;;  %v191_v40 = vld [vmem:[%s5233_s4 + $0x78] sm:$0xff] }
 0x9d0   :  { %v1433_v42 = vpop.xlane.xlu1 %1432 }
 0x9d1   :  { %4412 = vpow2.f32 %v1436_v41  ;;  %v1435_v43 = vsub.f32 %v1427_v36, %v1433_v42  ;;  %v175_v36 = vld [vmem:[%s5232_s3 + $0x18] sm:$0xff]  ;;  %v190_v41 = vld [vmem:[%s5233_s4 + $0x70] sm:$0xff]  ;;  %v189_v42 = vld [vmem:[%s5233_s4 + $0x68] sm:$0xff] }
 0x9d3   :  { %v1438_v32 = vmul.f32 1.442695, %v1435_v43  ;;  %v188_v43 = vld [vmem:[%s5233_s4 + $0x60] sm:$0xff] }
 0x9d4   :  { %v1451_v44 = vpop.permute.xlu1 %1450 }
 0x9d5   :  { %4414 = vpow2.f32 %v1438_v32  ;;  %4153 = vmatpush3.msra.mxu1 %v1451_v44  ;;  %v187_v32 = vld [vmem:[%s5233_s4 + $0x58] sm:$0xff]  ;;  %v186_v44 = vld [vmem:[%s5233_s4 + $0x50] sm:$0xff] }
 0x9d6   :  { %4184 = vmatprep.subr.mxu1 %v191_v40 }
 0x9d8   :  { %v1649_v51 = vpop.permute.xlu1 %1648 }
 0x9dc   :  { %v1647_v53 = vpop.permute.xlu1 %1646 }
 0x9de   :  { %v4413_v13 = vpop.eup %4412 }
 0x9df   :  { %v1440_v46 = vsel %vm278_vm10, %v4413_v13, 0.0 }
 0x9e0   :  { %1441 = vadd.xlane.f32.xlu0 %v1440_v46  ;;  %v184_v46 = vld [vmem:[%s5233_s4 + $0x40] sm:$0xff] }
 0x9e2   :  { %v4415_v26 = vpop.eup %4414 }
 0x9e3   :  { %v1443_v27 = vsel %vm278_vm10, %v4415_v26, 0.0 }
 0x9e4   :  { %1444 = vadd.xlane.f32.xlu0 %v1443_v27  ;;  %v182_v27 = vld [vmem:[%s5233_s4 + $0x30] sm:$0xff] }
 0x9fa   :  { %1526 = vrot.lane.b32.xlu0 %v4626_v31, %s4503_s0 }
 0x9fe   :  { %1604 = vrot.lane.b32.xlu0 %v4718_v45, %s4506_s13 }
 0xa02   :  { %1606 = vrot.lane.b32.xlu0 %v4720_v47, %s4506_s13 }
 0xa06   :  { %1614 = vrot.lane.b32.xlu0 %v1266_v22, %s4505_s12 }
 0xa0a   :  { %1642 = vrot.lane.b32.xlu0 %v4609_v28, %s4504_s11  ;;  %v1645_v28 = vpop.permute.xlu1 %1644 }
 0xa0e   :  { %v1613_v62 = vpop.permute.xlu1 %1612 }
 0xa69   :  { %v1442_v48 = vpop.xlane.xlu0 %1441 }
 0xa6a   :  { %4416 = vrcp.f32 %v1442_v48  ;;  %v181_v48 = vld [vmem:[%s5233_s4 + $0x28] sm:$0xff] }
 0xa6d   :  { %v1445_v49 = vpop.xlane.xlu0 %1444 }
 0xa6e   :  { %4418 = vrcp.f32 %v1445_v49  ;;  %v180_v49 = vld [vmem:[%s5233_s4 + $0x20] sm:$0xff] }
 0xa71   :  { %v1527_v50 = vpop.permute.xlu0 %1526 }
 0xa72   :  { %4158 = vmatpush3.msra.mxu0 %v1527_v50 }
 0xa73   :  { %4162 = vmatprep.subr.mxu0 %v1649_v51 }
 0xa75   :  { %v1605_v54 = vpop.permute.xlu0 %1604 }
 0xa76   :  { %v1626_v63 = vsel %vm278_vm10, %v4680_v1, %v1605_v54  ;;  %v1636_v1 = vsub.s32 0, %v4585_v15 }
 0xa77   :  { %v4417_v31 = vpop.eup %4416  ;;  %v1629_v0 = vsel %vm1628_vm11, %v1626_v63, %v1613_v62 }
 0xa78   :  { %v1448_v52 = vmul.f32 %v4417_v31, %v4413_v13  ;;  %v1637_v11 = vrot.slane %v4796_v10, %v1636_v1  ;;  %v185_v13 = vld [vmem:[%s5233_s4 + $0x48] sm:$0xff] }
 0xa79   :  { %v1607_v55 = vpop.permute.xlu0 %1606 }
 0xa7a   :  { %4155 = vmatmul.mubr.msk.f32.vlgmr.msra.gmra.mxu1 %vm278_vm10, %v1448_v52  ;;  %v1627_v5 = vsel %vm278_vm10, %v4682_v3, %v1607_v55 }
 0xa7b   :  { %v4419_v45 = vpop.eup %4418  ;;  %4185 = vmatpush3.msra.mxu1 %v191_v40 }
 0xa7c   :  { %v1449_v47 = vmul.f32 %v4419_v45, %v4415_v26  ;;  %4186 = vmatprep.subr.mxu1 %v190_v41  ;;  %v183_v26 = vld [vmem:[%s5233_s4 + $0x38] sm:$0xff] }
 0xa7d   :  { %v1615_v56 = vpop.permute.xlu0 %1614  ;;  %4187 = vmatpush3.msra.mxu1 %v190_v41 }
 0xa7e   :  { %4160 = vmatmul.mubr.msk.f32.vlgmr.msra.gmra.mxu0 %vm278_vm10, %v1449_v47  ;;  %v1630_v7 = vsel %vm1628_vm11, %v1627_v5, %v1615_v56  ;;  %4188 = vmatprep.subr.mxu1 %v189_v42  ;;  %v1766_v47 = vsub.s32 1, %v4585_v15  ;;  %v176_v5 = vld [vmem:[%s5233_s4] sm:$0xff] }
 0xa7f   :  { %4163 = vmatpush3.msra.mxu0 %v1649_v51  ;;  %4189 = vmatpush3.msra.mxu1 %v189_v42  ;;  %v4905_v42 = vld [vmem:[%s5231_s2 + $0x38] sm:$0xff] }
 0xa80   :  { %4164 = vmatprep.subr.mxu0 %v1647_v53  ;;  %4190 = vmatprep.subr.mxu1 %v188_v43  ;;  %v1767_v54 = vrot.slane %v4796_v10, %v1766_v47 }
 0xa81   :  { %4165 = vmatpush3.msra.mxu0 %v1647_v53  ;;  %v1643_v57 = vpop.permute.xlu0 %1642  ;;  %4191 = vmatpush3.msra.mxu1 %v188_v43  ;;  %v4910_v43 = vld [vmem:[%s5231_s2 + $0x30] sm:$0xff] }
 0xa82   :  { %4166 = vmatprep.subr.mxu0 %v1645_v28  ;;  %4192 = vmatprep.subr.mxu1 %v187_v32 }
 0xa83   :  { %4167 = vmatpush3.msra.mxu0 %v1645_v28  ;;  %4193 = vmatpush3.msra.mxu1 %v187_v32  ;;  %v1772_v28 = vsub.s32 2, %v4585_v15  ;;  %v4917_v32 = vld [vmem:[%s5231_s2 + $0x28] sm:$0xff] }
 0xa84   :  { %4168 = vmatprep.subr.mxu0 %v1643_v57  ;;  %4194 = vmatprep.subr.mxu1 %v186_v44 }
 0xa85   :  { %4169 = vmatpush3.msra.mxu0 %v1643_v57  ;;  %4195 = vmatpush3.msra.mxu1 %v186_v44  ;;  %v1773_v57 = vrot.slane %v4796_v10, %v1772_v28  ;;  %v4924_v44 = vld [vmem:[%s5231_s2 + $0x20] sm:$0xff] }
 0xa86   :  { %4173 = vmatprep.subr.mxu0 %v175_v36  ;;  %4196 = vmatprep.subr.mxu1 %v185_v13 }
 0xa87   :  { %4197 = vmatpush3.msra.mxu1 %v185_v13 }
 0xa88   :  { %4198 = vmatprep.subr.mxu1 %v184_v46 }
 0xa89   :  { %4199 = vmatpush3.msra.mxu1 %v184_v46 }
 0xa8a   :  { %4200 = vmatprep.subr.mxu1 %v183_v26 }
 0xa8b   :  { %4201 = vmatpush3.msra.mxu1 %v183_v26 }
 0xa8c   :  { %4202 = vmatprep.subr.mxu1 %v182_v27 }
 0xa8d   :  { %4203 = vmatpush3.msra.mxu1 %v182_v27 }
 0xa8e   :  { %4204 = vmatprep.subr.mxu1 %v181_v48 }
 0xa8f   :  { %4205 = vmatpush3.msra.mxu1 %v181_v48 }
 0xa90   :  { %4206 = vmatprep.subr.mxu1 %v180_v49 }
 0xa91   :  { %4207 = vmatpush3.msra.mxu1 %v180_v49 }
 0xb3a   :  { %v1522_v58 = vpop.f32.mrf.mxu1 }
 0xb3b   :  { %1620 = vrot.lane.b32.xlu1 %v1522_v58, %s4507_s14 }
 0xb3c   :  { %v4156_v59 = vpop.f32.mrf.mxu1 }
 0xb3e   :  { %v1598_v60 = vpop.f32.mrf.mxu0 }
 0xb3f   :  { %1622 = vrot.lane.b32.xlu1 %v1598_v60, %s4507_s14 }
 0xb40   :  { %v4161_v61 = vpop.f32.mrf.mxu0 }
 0xbad   :  { %v1621_v2 = vpop.permute.xlu1 %1620 }
 0xbae   :  { %v1632_v4 = vsel %vm1631_vm12, %v1629_v0, %v1621_v2  ;;  %v179_v0 = vld [vmem:[%s5233_s4 + $0x18] sm:$0xff]  ;;  %v178_v2 = vld [vmem:[%s5233_s4 + $0x10] sm:$0xff] }
 0xbaf   :  { %4170 = vmatprep.mubr.msk.f32.mxu0 %vm193_vm8, %v1632_v4  ;;  %4208 = vmatprep.subr.mxu1 %v179_v0  ;;  %v177_v4 = vld [vmem:[%s5233_s4 + $0x8] sm:$0xff] }
 0xbb0   :  { %4209 = vmatpush3.msra.mxu1 %v179_v0 }
 0xbb1   :  { %v1623_v8 = vpop.permute.xlu1 %1622  ;;  %4210 = vmatprep.subr.mxu1 %v178_v2 }
 0xbb2   :  { %v1633_v9 = vsel %vm1631_vm12, %v1630_v7, %v1623_v8  ;;  %4211 = vmatpush3.msra.mxu1 %v178_v2  ;;  %v1778_v7 = vsub.s32 3, %v4585_v15 }
 0xbb3   :  { %4171 = vmatmul.mubr.msk.f32.vlgmr.msra.gmra.mxu0 %vm193_vm8, %v1633_v9  ;;  %4212 = vmatprep.subr.mxu1 %v177_v4 }
 0xbb4   :  { %4174 = vmatpush3.msra.mxu0 %v175_v36  ;;  %4213 = vmatpush3.msra.mxu1 %v177_v4  ;;  %v1779_v8 = vrot.slane %v4796_v10, %v1778_v7 }
 0xbb5   :  { %4175 = vmatprep.subr.mxu0 %v174_v37  ;;  %4214 = vmatprep.subr.mxu1 %v176_v5 }
 0xbb6   :  { %4176 = vmatpush3.msra.mxu0 %v174_v37  ;;  %4215 = vmatpush3.msra.mxu1 %v176_v5 }
 0xbb7   :  { %4177 = vmatprep.subr.mxu0 %v173_v38  ;;  %4260 = vmatprep.subr.mxu1 %v4491_v6 }
 0xbb8   :  { %4178 = vmatpush3.msra.mxu0 %v173_v38 }
 0xbb9   :  { %4179 = vmatprep.subr.mxu0 %v172_v39 }
 0xbba   :  { %4180 = vmatpush3.msra.mxu0 %v172_v39 }
 0xbbb   :  { %4219 = vmatprep.subr.mxu0 %v4905_v42 }
 0xc73   :  { %v4172_v12 = vpop.f32.mrf.mxu0 }
 0xc74   :  { %v1732_v3 = vadd.f32 %v4172_v12, %v1637_v11 }
 0xc75   :  { %v1726_v14 = vpop.f32.mrf.mxu0 }
 0xc76   :  { %v1727_v16 = vadd.f32 %v1726_v14, %v1637_v11  ;;  %v1736_v17 = vadd.f32 %v4614_v29, %v1732_v3 }
 0xc78   :  { %v1740_v18 = vsel %vm193_vm8, %v1736_v17, 0.0  ;;  %v1735_v19 = vadd.f32 %v1727_v16, %v4616_v30 }
 0xc79   :  { %1741 = vadd.xlane.f32.xlu1 %v1740_v18 }
 0xc7a   :  { %v1737_v20 = vsel %vm193_vm8, %v1735_v19, 0.0 }
 0xc7b   :  { %1738 = vadd.xlane.f32.xlu0 %v1737_v20 }
 0xd02   :  { %v1742_v21 = vpop.xlane.xlu1 %1741 }
 0xd03   :  { %v1745_v22 = vmul.f32 0.03125, %v1742_v21 }
 0xd04   :  { %v1739_v23 = vpop.xlane.xlu0 %1738 }
 0xd05   :  { %v1744_v24 = vmul.f32 0.03125, %v1739_v23  ;;  %v4805_v25 = vsub.f32 %v1736_v17, %v1745_v22  ;;  %v1865_v17 = vsub.s32 4, %v4585_v15 }
 0xd07   :  { %v4807_v33 = vsub.f32 %v1735_v19, %v1744_v24  ;;  %v1749_v30 = vmul.f32 %v4805_v25, %v4805_v25  ;;  %v1866_v18 = vrot.slane %v4796_v10, %v1865_v17 }
 0xd09   :  { %v1748_v34 = vmul.f32 %v4807_v33, %v4807_v33  ;;  %v1753_v35 = vsel %vm193_vm8, %v1749_v30, 0.0 }
 0xd0b   :  { %v1750_v29 = vsel %vm193_vm8, %v1748_v34, 0.0 }
 0xd0c   :  { %1751 = vadd.xlane.f32.xlu0 %v1750_v29 }
 0xd10   :  { %1754 = vadd.xlane.f32.xlu0 %v1753_v35 }
 0xd95   :  { %v1752_v50 = vpop.xlane.xlu0 %1751 }
 0xd96   :  { %v1756_v51 = vmul.f32 0.03125, %v1752_v50  ;;  %v1972_v50 = vsub.s32 5, %v4585_v15 }
 0xd98   :  { %v1758_v31 = vadd.f32 1e-05, %v1756_v51 }
 0xd99   :  { %v1755_v52 = vpop.xlane.xlu0 %1754 }
 0xd9a   :  { %4420 = vrsqrt.f32 %v1758_v31  ;;  %v1757_v45 = vmul.f32 0.03125, %v1755_v52  ;;  %v1973_v31 = vrot.slane %v4796_v10, %v1972_v50  ;;  %v1978_v52 = vsub.s32 6, %v4585_v15 }
 0xd9c   :  { %v1759_v53 = vadd.f32 1e-05, %v1757_v45 }
 0xd9e   :  { %4422 = vrsqrt.f32 %v1759_v53 }
 0xda7   :  { %v4421_v55 = vpop.eup %4420 }
 0xda8   :  { %v1762_v56 = vmul.f32 %v4421_v55, %v4807_v33 }
 0xdaa   :  { %v1768_v58 = vmul.f32 %v1767_v54, %v1762_v56  ;;  %v1979_v56 = vrot.slane %v4796_v10, %v1978_v52 }
 0xdab   :  { %v4423_v59 = vpop.eup %4422 }
 0xdac   :  { %v1763_v60 = vmul.f32 %v4423_v59, %v4805_v25  ;;  %v1774_v61 = vadd.f32 %v1773_v57, %v1768_v58 }
 0xdae   :  { %v1769_v62 = vmul.f32 %v1767_v54, %v1763_v60  ;;  %4181 = vmatprep.mubr.msk.f32.mxu0 %vm193_vm8, %v1774_v61 }
 0xdb0   :  { %v1775_v63 = vadd.f32 %v1773_v57, %v1769_v62 }
 0xdb2   :  { %4182 = vmatmul.mubr.msk.f32.vlgmr.msra.gmra.mxu0 %vm193_vm8, %v1775_v63 }
 0xdb3   :  { %4220 = vmatpush3.msra.mxu0 %v4905_v42 }
 0xdb4   :  { %4221 = vmatprep.subr.mxu0 %v4910_v43 }
 0xdb5   :  { %4222 = vmatpush3.msra.mxu0 %v4910_v43 }
 0xdb6   :  { %4223 = vmatprep.subr.mxu0 %v4917_v32 }
 0xdb7   :  { %4224 = vmatpush3.msra.mxu0 %v4917_v32 }
 0xdb8   :  { %4225 = vmatprep.subr.mxu0 %v4924_v44 }
 0xdb9   :  { %4226 = vmatpush3.msra.mxu0 %v4924_v44 }
 0xdba   :  { %4230 = vmatprep.subr.mxu0 %v4491_v6 }
 0xe72   :  { %v4183_v9 = vpop.f32.mrf.mxu0 }
 0xe73   :  { %v1858_v11 = vadd.f32 %v4183_v9, %v1779_v8 }
 0xe74   :  { %v1852_v12 = vpop.f32.mrf.mxu0 }
 0xe75   :  { %v1853_v3 = vadd.f32 %v1852_v12, %v1779_v8  ;;  %v1862_v16 = vmax.f32 %v1858_v11, 0.0 }
 0xe77   :  { %v1861_v14 = vmax.f32 %v1853_v3, 0.0 }
 0xe79   :  { %4216 = vmatprep.mubr.f32.mxu1 %v1861_v14 }
 0xe7a   :  { %4217 = vmatmul.mubr.f32.vlgmr.msra.gmra.mxu1 %v1862_v16 }
 0xe7b   :  { %4262 = vmatprep.mubr.msk.f32.mxu1 %vm4492_vm9, %v4491_v6 }
 0xf3a   :  { %v4218_v19 = vpop.f32.mrf.mxu1 }
 0xf3b   :  { %v1939_v20 = vadd.f32 %v4218_v19, %v1866_v18 }
 0xf3c   :  { %v1933_v21 = vpop.f32.mrf.mxu1 }
 0xf3d   :  { %v1934_v22 = vadd.f32 %v1933_v21, %v1866_v18  ;;  %v1943_v23 = vadd.f32 %v1939_v20, %v1775_v63 }
 0xf3f   :  { %v1947_v24 = vsel %vm193_vm8, %v1943_v23, 0.0  ;;  %v1942_v25 = vadd.f32 %v1934_v22, %v1774_v61 }
 0xf40   :  { %1948 = vadd.xlane.f32.xlu0 %v1947_v24 }
 0xf41   :  { %v1944_v33 = vsel %vm193_vm8, %v1942_v25, 0.0 }
 0xf42   :  { %1945 = vadd.xlane.f32.xlu1 %v1944_v33 }
 0xfc9   :  { %v1949_v34 = vpop.xlane.xlu0 %1948 }
 0xfca   :  { %v1951_v29 = vmul.f32 0.03125, %v1949_v34 }
 0xfcb   :  { %v1946_v30 = vpop.xlane.xlu1 %1945 }
 0xfcc   :  { %v1953_v35 = vsub.f32 %v1943_v23, %v1951_v29  ;;  %v1950_v36 = vmul.f32 0.03125, %v1946_v30 }
 0xfce   :  { %v1952_v37 = vsub.f32 %v1942_v25, %v1950_v36  ;;  %v1955_v38 = vmul.f32 %v1953_v35, %v1953_v35 }
 0xfd0   :  { %v1959_v39 = vsel %vm193_vm8, %v1955_v38, 0.0  ;;  %v1954_v40 = vmul.f32 %v1952_v37, %v1952_v37 }
 0xfd1   :  { %1960 = vadd.xlane.f32.xlu0 %v1959_v39 }
 0xfd2   :  { %v1956_v41 = vsel %vm193_vm8, %v1954_v40, 0.0 }
 0xfd3   :  { %1957 = vadd.xlane.f32.xlu1 %v1956_v41 }
0x105a   :  { %v1961_v13 = vpop.xlane.xlu0 %1960 }
0x105b   :  { %v1963_v46 = vmul.f32 0.03125, %v1961_v13 }
0x105c   :  { %v1958_v26 = vpop.xlane.xlu1 %1957 }
0x105d   :  { %v1965_v27 = vadd.f32 1e-05, %v1963_v46  ;;  %v1962_v48 = vmul.f32 0.03125, %v1958_v26 }
0x105f   :  { %4424 = vrsqrt.f32 %v1965_v27  ;;  %v1964_v49 = vadd.f32 1e-05, %v1962_v48 }
0x1061   :  { %4426 = vrsqrt.f32 %v1964_v49 }
0x106c   :  { %v4425_v51 = vpop.eup %4424 }
0x106d   :  { %v1969_v45 = vmul.f32 %v4425_v51, %v1953_v35 }
0x106e   :  { %v4427_v53 = vpop.eup %4426 }
0x106f   :  { %v1968_v54 = vmul.f32 %v4427_v53, %v1952_v37  ;;  %v1975_v55 = vmul.f32 %v1973_v31, %v1969_v45 }
0x1071   :  { %v1974_v57 = vmul.f32 %v1973_v31, %v1968_v54  ;;  %v4941_v59 = vadd.f32 %v1979_v56, %v1975_v55 }
0x1073   :  { %v4939_v58 = vadd.f32 %v1979_v56, %v1974_v57 }
0x1075   :  { %4227 = vmatprep.mubr.msk.f32.mxu0 %vm193_vm8, %v4939_v58 }
0x1076   :  { %4228 = vmatmul.mubr.msk.f32.vlgmr.msra.gmra.mxu0 %vm193_vm8, %v4941_v59 }
0x1077   :  { %4232 = vmatprep.mubr.msk.f32.mxu0 %vm4492_vm9, %v4491_v6 }
0x1136   :  { %v4949_v60 = vpop.f32.mrf.mxu0 }
0x1137   :  { %2170 = vrot.lane.b32.xlu0 %v4949_v60, %s4493_s25 }
0x1138   :  { %v4953_v10 = vpop.f32.mrf.mxu0 }
0x1139   :  { %2093 = vrot.lane.b32.xlu1 %v4953_v10, %s4493_s25 }
0x11a9   :  { %v2171_v62 = vpop.permute.xlu0 %2170 }
0x11ab   :  { %v2094_v61 = vpop.permute.xlu1 %2093 }
0x11ac   :  { %4231 = vmatpush3.xpose.msk.msra.mxu0 %vm278_vm10, %v2094_v61 }
0x11ad   :  { %4235 = vmatprep.subr.mxu0 %v4491_v6 }
0x11af   :  { %4233 = vmatmul.mubr.msk.f32.vlgmr.msra.gmra.mxu0 %vm278_vm10, %v4953_v10 }
0x11b0   :  { %4236 = vmatpush3.xpose.msk.msra.mxu0 %vm278_vm10, %v2171_v62  ;;  %4237 = vmatprep.mubr.msk.f32.mxu0 %vm4492_vm9, %v4491_v6 }
0x11b1   :  { %4240 = vmatprep.subr.mxu0 %v4491_v6 }
0x11b3   :  { %4238 = vmatmul.mubr.msk.f32.vlgmr.msra.gmra.mxu0 %vm278_vm10, %v4949_v60 }
0x11b4   :  { %4242 = vmatprep.mubr.msk.f32.mxu0 %vm4492_vm9, %v4491_v6 }
0x126f   :  { %v2165_v63 = vpop.f32.mrf.mxu0 }
0x1270   :  { %v2246_v0 = vmul.f32 0.35355338, %v2165_v63 }
0x1271   :  { %v4234_v2 = vpop.f32.mrf.mxu0 }
0x1272   :  { %v2248_v4 = vsel %vm278_vm10, %v2246_v0, -inf }
0x1273   :  { %2249 = vmax.xlane.f32.xlu1 %v2248_v4  ;;  %v2242_v5 = vpop.f32.mrf.mxu0 }
0x1274   :  { %v2247_v8 = vmul.f32 0.35355338, %v2242_v5 }
0x1275   :  { %v4239_v9 = vpop.f32.mrf.mxu0 }
0x1276   :  { %v2251_v11 = vsel %vm278_vm10, %v2247_v8, -inf }
0x1277   :  { %2252 = vmax.xlane.f32.xlu0 %v2251_v11 }
0x1284   :  { %2270 = vrot.lane.b32.xlu1 %v4953_v10, %s4494_s26 }
0x12fc   :  { %v2250_v12 = vpop.xlane.xlu1 %2249 }
0x12fd   :  { %v2254_v3 = vsub.f32 %v2246_v0, %v2250_v12 }
0x12ff   :  { %v2256_v14 = vmul.f32 1.442695, %v2254_v3 }
0x1300   :  { %v2271_v16 = vpop.permute.xlu1 %2270  ;;  %v2253_v18 = vpop.xlane.xlu0 %2252 }
0x1301   :  { %4428 = vpow2.f32 %v2256_v14  ;;  %v2255_v19 = vsub.f32 %v2247_v8, %v2253_v18  ;;  %4241 = vmatpush3.msra.mxu0 %v2271_v16 }
0x1302   :  { %4245 = vmatprep.subr.mxu0 %v4491_v6 }
0x1303   :  { %v2258_v20 = vmul.f32 1.442695, %v2255_v19 }
0x1305   :  { %4430 = vpow2.f32 %v2258_v20 }
0x130e   :  { %v4429_v21 = vpop.eup %4428 }
0x130f   :  { %v2260_v22 = vsel %vm278_vm10, %v4429_v21, 0.0 }
0x1310   :  { %2261 = vadd.xlane.f32.xlu1 %v2260_v22 }
0x1312   :  { %v4431_v23 = vpop.eup %4430 }
0x1313   :  { %v2263_v24 = vsel %vm278_vm10, %v4431_v23, 0.0 }
0x1314   :  { %2264 = vadd.xlane.f32.xlu0 %v2263_v24 }
0x1321   :  { %2424 = vrot.lane.b32.xlu1 %v4953_v10, %s4495_s27 }
0x1325   :  { %2422 = vrot.lane.b32.xlu1 %v4953_v10, %s4496_s28 }
0x1329   :  { %2500 = vrot.lane.b32.xlu1 %v4949_v60, %s4496_s28 }
0x132a   :  { %2346 = vrot.lane.b32.xlu0 %v4949_v60, %s4494_s26 }
0x132e   :  { %2502 = vrot.lane.b32.xlu0 %v4949_v60, %s4495_s27 }
0x1399   :  { %v2262_v25 = vpop.xlane.xlu1 %2261 }
0x139a   :  { %4432 = vrcp.f32 %v2262_v25 }
0x139d   :  { %v2265_v33 = vpop.xlane.xlu0 %2264  ;;  %v2425_v30 = vpop.permute.xlu1 %2424 }
0x139e   :  { %4434 = vrcp.f32 %v2265_v33 }
0x13a1   :  { %v2347_v35 = vpop.permute.xlu0 %2346  ;;  %v2423_v38 = vpop.permute.xlu1 %2422 }
0x13a5   :  { %v2503_v39 = vpop.permute.xlu0 %2502  ;;  %v2501_v40 = vpop.permute.xlu1 %2500 }
0x13a7   :  { %v4433_v34 = vpop.eup %4432 }
0x13a8   :  { %v2268_v29 = vmul.f32 %v4433_v34, %v4429_v21 }
0x13aa   :  { %4243 = vmatmul.mubr.msk.f32.vlgmr.msra.gmra.mxu0 %vm278_vm10, %v2268_v29 }
0x13ab   :  { %v4435_v36 = vpop.eup %4434  ;;  %4246 = vmatpush3.msra.mxu0 %v2347_v35  ;;  %4247 = vmatprep.mubr.msk.f32.mxu0 %vm4492_vm9, %v4491_v6 }
0x13ac   :  { %4250 = vmatprep.subr.mxu0 %v4491_v6  ;;  %v2269_v37 = vmul.f32 %v4435_v36, %v4431_v23 }
0x13ae   :  { %4248 = vmatmul.mubr.msk.f32.vlgmr.msra.gmra.mxu0 %vm278_vm10, %v2269_v37 }
0x13af   :  { %4251 = vmatpush3.xpose.msk.msra.mxu0 %vm278_vm10, %v2425_v30  ;;  %4252 = vmatprep.mubr.msk.f32.mxu0 %vm4492_vm9, %v4491_v6 }
0x13b0   :  { %4255 = vmatprep.subr.mxu0 %v4491_v6 }
0x13b2   :  { %4253 = vmatmul.mubr.msk.f32.vlgmr.msra.gmra.mxu0 %vm278_vm10, %v2423_v38 }
0x13b3   :  { %4256 = vmatpush3.xpose.msk.msra.mxu0 %vm278_vm10, %v2503_v39  ;;  %4257 = vmatprep.mubr.msk.f32.mxu0 %vm4492_vm9, %v4491_v6 }
0x13b4   :  { %4265 = vmatprep.subr.mxu0 %v4491_v6 }
0x13b6   :  { %4258 = vmatmul.mubr.msk.f32.vlgmr.msra.gmra.mxu0 %vm278_vm10, %v2501_v40 }
0x13b7   :  { %4267 = vmatprep.mubr.msk.f32.mxu0 %vm4492_vm9, %v4491_v6 }
0x146a   :  { %v5003_v41 = vpop.f32.mrf.mxu0 }
0x146c   :  { %v4244_v13 = vpop.f32.mrf.mxu0 }
0x146e   :  { %v5005_v46 = vpop.f32.mrf.mxu0 }
0x1470   :  { %v4249_v26 = vpop.f32.mrf.mxu0 }
0x1472   :  { %v2496_v27 = vpop.f32.mrf.mxu0 }
0x1473   :  { %v2578_v48 = vmul.f32 0.35355338, %v2496_v27 }
0x1474   :  { %v4254_v49 = vpop.f32.mrf.mxu0 }
0x1475   :  { %v2580_v51 = vsel %vm278_vm10, %v2578_v48, -inf }
0x1476   :  { %2581 = vmax.xlane.f32.xlu0 %v2580_v51  ;;  %v2574_v31 = vpop.f32.mrf.mxu0 }
0x1477   :  { %v2579_v45 = vmul.f32 0.35355338, %v2574_v31 }
0x1478   :  { %v4259_v53 = vpop.f32.mrf.mxu0 }
0x1479   :  { %v2583_v54 = vsel %vm278_vm10, %v2579_v45, -inf }
0x147a   :  { %2584 = vmax.xlane.f32.xlu1 %v2583_v54 }
0x148b   :  { %2602 = vrot.lane.b32.xlu1 %v4953_v10, %s4497_s29 }
0x148c   :  { %2678 = vrot.lane.b32.xlu0 %v4949_v60, %s4497_s29 }
0x148f   :  { %2756 = vrot.lane.b32.xlu1 %v4953_v10, %s4498_s30 }
0x1493   :  { %2834 = vrot.lane.b32.xlu1 %v4949_v60, %s4498_s30 }
0x1497   :  { %2832 = vrot.lane.b32.xlu1 %v4949_v60, %s4499_s7 }
0x14ff   :  { %v2582_v55 = vpop.xlane.xlu0 %2581 }
0x1500   :  { %v2586_v56 = vsub.f32 %v2578_v48, %v2582_v55 }
0x1502   :  { %v2588_v57 = vmul.f32 1.442695, %v2586_v56 }
0x1503   :  { %v2679_v61 = vpop.permute.xlu0 %2678  ;;  %v2585_v62 = vpop.xlane.xlu1 %2584 }
0x1504   :  { %4436 = vpow2.f32 %v2588_v57  ;;  %v2587_v63 = vsub.f32 %v2579_v45, %v2585_v62  ;;  %4266 = vmatpush3.msra.mxu0 %v2679_v61 }
0x1505   :  { %4275 = vmatprep.subr.mxu0 %v4491_v6 }
0x1506   :  { %v2590_v0 = vmul.f32 1.442695, %v2587_v63 }
0x1507   :  { %v2603_v2 = vpop.permute.xlu1 %2602 }
0x1508   :  { %4438 = vpow2.f32 %v2590_v0  ;;  %4261 = vmatpush3.msra.mxu1 %v2603_v2 }
0x1509   :  { %4270 = vmatprep.subr.mxu1 %v4491_v6 }
0x150b   :  { %v2757_v3 = vpop.permute.xlu1 %2756 }
0x150f   :  { %v2835_v19 = vpop.permute.xlu1 %2834 }
0x1511   :  { %v4437_v4 = vpop.eup %4436 }
0x1512   :  { %v2592_v5 = vsel %vm278_vm10, %v4437_v4, 0.0 }
0x1513   :  { %2593 = vadd.xlane.f32.xlu0 %v2592_v5  ;;  %v2833_v22 = vpop.permute.xlu1 %2832 }
0x1515   :  { %v4439_v8 = vpop.eup %4438 }
0x1516   :  { %v2595_v9 = vsel %vm278_vm10, %v4439_v8, 0.0 }
0x1517   :  { %2596 = vadd.xlane.f32.xlu0 %v2595_v9 }
0x152d   :  { %2754 = vrot.lane.b32.xlu0 %v4953_v10, %s4499_s7 }
0x159c   :  { %v2594_v11 = vpop.xlane.xlu0 %2593 }
0x159d   :  { %4440 = vrcp.f32 %v2594_v11 }
0x15a0   :  { %v2597_v12 = vpop.xlane.xlu0 %2596 }
0x15a1   :  { %4442 = vrcp.f32 %v2597_v12 }
0x15a4   :  { %v2755_v21 = vpop.permute.xlu0 %2754 }
0x15aa   :  { %v4441_v14 = vpop.eup %4440 }
0x15ab   :  { %v2600_v16 = vmul.f32 %v4441_v14, %v4437_v4 }
0x15ad   :  { %4263 = vmatmul.mubr.msk.f32.vlgmr.msra.gmra.mxu1 %vm278_vm10, %v2600_v16 }
0x15ae   :  { %v4443_v18 = vpop.eup %4442  ;;  %4271 = vmatpush3.xpose.msk.msra.mxu1 %vm278_vm10, %v2757_v3  ;;  %4272 = vmatprep.mubr.msk.f32.mxu1 %vm4492_vm9, %v4491_v6 }
0x15af   :  { %v2601_v20 = vmul.f32 %v4443_v18, %v4439_v8  ;;  %4280 = vmatprep.subr.mxu1 %v4491_v6 }
0x15b1   :  { %4268 = vmatmul.mubr.msk.f32.vlgmr.msra.gmra.mxu0 %vm278_vm10, %v2601_v20  ;;  %4273 = vmatmul.mubr.msk.f32.vlgmr.msra.gmra.mxu1 %vm278_vm10, %v2755_v21 }
0x15b2   :  { %4276 = vmatpush3.xpose.msk.msra.mxu0 %vm278_vm10, %v2835_v19  ;;  %4277 = vmatprep.mubr.msk.f32.mxu0 %vm4492_vm9, %v4491_v6 }
0x15b3   :  { %4285 = vmatprep.subr.mxu0 %v4491_v6  ;;  %4282 = vmatprep.mubr.msk.f32.mxu1 %vm4492_vm9, %v4491_v6 }
0x15b5   :  { %4278 = vmatmul.mubr.msk.f32.vlgmr.msra.gmra.mxu0 %vm278_vm10, %v2833_v22 }
0x15b6   :  { %4287 = vmatprep.mubr.msk.f32.mxu0 %vm4492_vm9, %v4491_v6 }
0x166d   :  { %v5041_v23 = vpop.f32.mrf.mxu1 }
0x166f   :  { %v4264_v24 = vpop.f32.mrf.mxu1 }
0x1671   :  { %v5043_v25 = vpop.f32.mrf.mxu0  ;;  %v2828_v33 = vpop.f32.mrf.mxu1 }
0x1672   :  { %v2910_v34 = vmul.f32 0.35355338, %v2828_v33 }
0x1673   :  { %v4269_v29 = vpop.f32.mrf.mxu0  ;;  %v4274_v30 = vpop.f32.mrf.mxu1 }
0x1674   :  { %v2912_v35 = vsel %vm278_vm10, %v2910_v34, -inf }
0x1675   :  { %2913 = vmax.xlane.f32.xlu0 %v2912_v35  ;;  %v2906_v36 = vpop.f32.mrf.mxu0 }
0x1676   :  { %v2911_v37 = vmul.f32 0.35355338, %v2906_v36 }
0x1677   :  { %v4279_v38 = vpop.f32.mrf.mxu0 }
0x1678   :  { %v2915_v39 = vsel %vm278_vm10, %v2911_v37, -inf }
0x1679   :  { %2916 = vmax.xlane.f32.xlu1 %v2915_v39 }
0x168a   :  { %2934 = vrot.lane.b32.xlu1 %v4953_v10, %s4500_s8 }
0x168b   :  { %3010 = vrot.lane.b32.xlu0 %v4949_v60, %s4500_s8 }
0x168e   :  { %3088 = vrot.lane.b32.xlu1 %v4953_v10, %s4501_s9 }
0x1692   :  { %3166 = vrot.lane.b32.xlu1 %v4949_v60, %s4501_s9 }
0x1696   :  { %3164 = vrot.lane.b32.xlu1 %v4949_v60, %s4502_s10 }
0x16fe   :  { %v2914_v40 = vpop.xlane.xlu0 %2913 }
0x16ff   :  { %v2918_v13 = vsub.f32 %v2910_v34, %v2914_v40 }
0x1701   :  { %v2920_v26 = vmul.f32 1.442695, %v2918_v13 }
0x1702   :  { %v3011_v27 = vpop.permute.xlu0 %3010  ;;  %v2917_v48 = vpop.xlane.xlu1 %2916 }
0x1703   :  { %4444 = vpow2.f32 %v2920_v26  ;;  %v2919_v49 = vsub.f32 %v2911_v37, %v2917_v48  ;;  %4286 = vmatpush3.msra.mxu0 %v3011_v27 }
0x1704   :  { %4295 = vmatprep.subr.mxu0 %v4491_v6 }
0x1705   :  { %v2922_v51 = vmul.f32 1.442695, %v2919_v49 }
0x1706   :  { %v2935_v31 = vpop.permute.xlu1 %2934 }
0x1707   :  { %4446 = vpow2.f32 %v2922_v51  ;;  %4281 = vmatpush3.msra.mxu1 %v2935_v31 }
0x1708   :  { %4290 = vmatprep.subr.mxu1 %v4491_v6 }
0x170a   :  { %v3089_v61 = vpop.permute.xlu1 %3088 }
0x170e   :  { %v3167_v2 = vpop.permute.xlu1 %3166 }
0x1710   :  { %v4445_v45 = vpop.eup %4444 }
0x1711   :  { %v2924_v53 = vsel %vm278_vm10, %v4445_v45, 0.0 }
0x1712   :  { %2925 = vadd.xlane.f32.xlu0 %v2924_v53  ;;  %v3165_v8 = vpop.permute.xlu1 %3164 }
0x1714   :  { %v4447_v54 = vpop.eup %4446 }
0x1715   :  { %v2927_v55 = vsel %vm278_vm10, %v4447_v54, 0.0 }
0x1716   :  { %2928 = vadd.xlane.f32.xlu0 %v2927_v55 }
0x172c   :  { %3086 = vrot.lane.b32.xlu0 %v4953_v10, %s4502_s10 }
0x179b   :  { %v2926_v56 = vpop.xlane.xlu0 %2925 }
0x179c   :  { %4448 = vrcp.f32 %v2926_v56 }
0x179f   :  { %v2929_v57 = vpop.xlane.xlu0 %2928 }
0x17a0   :  { %4450 = vrcp.f32 %v2929_v57 }
0x17a3   :  { %v3087_v5 = vpop.permute.xlu0 %3086 }
0x17a9   :  { %v4449_v62 = vpop.eup %4448 }
0x17aa   :  { %v2932_v63 = vmul.f32 %v4449_v62, %v4445_v45 }
0x17ac   :  { %4283 = vmatmul.mubr.msk.f32.vlgmr.msra.gmra.mxu1 %vm278_vm10, %v2932_v63 }
0x17ad   :  { %v4451_v0 = vpop.eup %4450  ;;  %4291 = vmatpush3.xpose.msk.msra.mxu1 %vm278_vm10, %v3089_v61  ;;  %4292 = vmatprep.mubr.msk.f32.mxu1 %vm4492_vm9, %v4491_v6 }
0x17ae   :  { %v2933_v4 = vmul.f32 %v4451_v0, %v4447_v54  ;;  %4300 = vmatprep.subr.mxu1 %v4491_v6 }
0x17b0   :  { %4288 = vmatmul.mubr.msk.f32.vlgmr.msra.gmra.mxu0 %vm278_vm10, %v2933_v4  ;;  %4293 = vmatmul.mubr.msk.f32.vlgmr.msra.gmra.mxu1 %vm278_vm10, %v3087_v5 }
0x17b1   :  { %4296 = vmatpush3.xpose.msk.msra.mxu0 %vm278_vm10, %v3167_v2  ;;  %4297 = vmatprep.mubr.msk.f32.mxu0 %vm4492_vm9, %v4491_v6 }
0x17b2   :  { %4305 = vmatprep.subr.mxu0 %v4491_v6  ;;  %4302 = vmatprep.mubr.msk.f32.mxu1 %vm4492_vm9, %v4491_v6 }
0x17b4   :  { %4298 = vmatmul.mubr.msk.f32.vlgmr.msra.gmra.mxu0 %vm278_vm10, %v3165_v8 }
0x17b5   :  { %4307 = vmatprep.mubr.msk.f32.mxu0 %vm4492_vm9, %v4491_v6 }
0x186c   :  { %v3006_v9 = vpop.f32.mrf.mxu1 }
0x186e   :  { %v4284_v11 = vpop.f32.mrf.mxu1 }
0x1870   :  { %v3082_v12 = vpop.f32.mrf.mxu0  ;;  %v3160_v3 = vpop.f32.mrf.mxu1 }
0x1871   :  { %v3242_v14 = vmul.f32 0.35355338, %v3160_v3 }
0x1872   :  { %v4289_v16 = vpop.f32.mrf.mxu0  ;;  %v4294_v18 = vpop.f32.mrf.mxu1 }
0x1873   :  { %v3244_v19 = vsel %vm278_vm10, %v3242_v14, -inf }
0x1874   :  { %3245 = vmax.xlane.f32.xlu0 %v3244_v19  ;;  %v3238_v20 = vpop.f32.mrf.mxu0 }
0x1875   :  { %v3243_v21 = vmul.f32 0.35355338, %v3238_v20 }
0x1876   :  { %v4299_v22 = vpop.f32.mrf.mxu0 }
0x1877   :  { %v3247_v24 = vsel %vm278_vm10, %v3243_v21, -inf }
0x1878   :  { %3248 = vmax.xlane.f32.xlu1 %v3247_v24 }
0x1889   :  { %3266 = vrot.lane.b32.xlu1 %v4953_v10, %s4503_s0 }
0x188d   :  { %3462 = vrot.lane.b32.xlu1 %v4905_v42, %s4504_s11 }
0x1891   :  { %3460 = vrot.lane.b32.xlu1 %v4910_v43, %s4504_s11 }
0x1895   :  { %3458 = vrot.lane.b32.xlu1 %v4917_v32, %s4504_s11 }
0x1899   :  { %3428 = vrot.lane.b32.xlu1 %v3006_v9, %s4505_s12 }
0x18fd   :  { %v3246_v6 = vpop.xlane.xlu0 %3245 }
0x18fe   :  { %v3250_v33 = vsub.f32 %v3242_v14, %v3246_v6 }
0x1900   :  { %v3252_v34 = vmul.f32 1.442695, %v3250_v33  ;;  %v3855_v33 = vld [vmem:[%s5232_s3 + $0x38] sm:$0xff] }
0x1901   :  { %v3249_v29 = vpop.xlane.xlu1 %3248 }
0x1902   :  { %4452 = vpow2.f32 %v3252_v34  ;;  %v3251_v30 = vsub.f32 %v3243_v21, %v3249_v29  ;;  %v3854_v34 = vld [vmem:[%s5232_s3 + $0x30] sm:$0xff]  ;;  %v3853_v29 = vld [vmem:[%s5232_s3 + $0x28] sm:$0xff] }
0x1904   :  { %v3254_v35 = vmul.f32 1.442695, %v3251_v30  ;;  %v3852_v30 = vld [vmem:[%s5232_s3 + $0x20] sm:$0xff] }
0x1905   :  { %v3267_v36 = vpop.permute.xlu1 %3266 }
0x1906   :  { %4454 = vpow2.f32 %v3254_v35  ;;  %4301 = vmatpush3.msra.mxu1 %v3267_v36  ;;  %v3871_v35 = vld [vmem:[%s5233_s4 + $0xf8] sm:$0xff]  ;;  %v3870_v36 = vld [vmem:[%s5233_s4 + $0xf0] sm:$0xff] }
0x1909   :  { %v3463_v10 = vpop.permute.xlu1 %3462 }
0x190a   :  { %4310 = vmatprep.subr.mxu1 %v3463_v10 }
0x190d   :  { %v3461_v26 = vpop.permute.xlu1 %3460 }
0x190f   :  { %v4453_v42 = vpop.eup %4452 }
0x1910   :  { %v3256_v43 = vsel %vm278_vm10, %v4453_v42, 0.0 }
0x1911   :  { %3257 = vadd.xlane.f32.xlu0 %v3256_v43  ;;  %v3867_v43 = vld [vmem:[%s5233_s4 + $0xd8] sm:$0xff] }
0x1913   :  { %v4455_v37 = vpop.eup %4454 }
0x1914   :  { %v3259_v32 = vsel %vm278_vm10, %v4455_v37, 0.0 }
0x1915   :  { %3260 = vadd.xlane.f32.xlu0 %v3259_v32  ;;  %v3865_v32 = vld [vmem:[%s5233_s4 + $0xc8] sm:$0xff] }
0x192b   :  { %3342 = vrot.lane.b32.xlu0 %v4949_v60, %s4503_s0 }
0x192f   :  { %3420 = vrot.lane.b32.xlu0 %v5041_v23, %s4506_s13 }
0x1933   :  { %3422 = vrot.lane.b32.xlu0 %v5043_v25, %s4506_s13  ;;  %v3459_v25 = vpop.permute.xlu1 %3458 }
0x1937   :  { %3430 = vrot.lane.b32.xlu0 %v3082_v12, %s4505_s12  ;;  %v3429_v55 = vpop.permute.xlu1 %3428 }
0x193b   :  { %3456 = vrot.lane.b32.xlu0 %v4924_v44, %s4504_s11 }
0x199a   :  { %v3258_v38 = vpop.xlane.xlu0 %3257 }
0x199b   :  { %4456 = vrcp.f32 %v3258_v38  ;;  %v3864_v38 = vld [vmem:[%s5233_s4 + $0xc0] sm:$0xff] }
0x199e   :  { %v3261_v39 = vpop.xlane.xlu0 %3260 }
0x199f   :  { %4458 = vrcp.f32 %v3261_v39  ;;  %v3863_v39 = vld [vmem:[%s5233_s4 + $0xb8] sm:$0xff] }
0x19a2   :  { %v3343_v40 = vpop.permute.xlu0 %3342 }
0x19a3   :  { %4306 = vmatpush3.msra.mxu0 %v3343_v40  ;;  %v3862_v40 = vld [vmem:[%s5233_s4 + $0xb0] sm:$0xff] }
0x19a4   :  { %4321 = vmatprep.subr.mxu0 %v3855_v33 }
0x19a6   :  { %v3421_v44 = vpop.permute.xlu0 %3420 }
0x19a7   :  { %v3442_v56 = vsel %vm278_vm10, %v5003_v41, %v3421_v44  ;;  %v5118_v41 = vld [vmem:[%s5234_s5 + $0x8] sm:$0x7f] }
0x19a8   :  { %v4457_v13 = vpop.eup %4456  ;;  %v3444_v57 = vsel %vm1628_vm11, %v3442_v56, %v3429_v55  ;;  %v3451_v5 = vrot.slane %v5118_v41, %v1636_v1 }
0x19a9   :  { %v3264_v60 = vmul.f32 %v4457_v13, %v4453_v42  ;;  %v3868_v42 = vld [vmem:[%s5233_s4 + $0xe0] sm:$0xff]  ;;  %v3861_v13 = vld [vmem:[%s5233_s4 + $0xa8] sm:$0xff] }
0x19aa   :  { %v3423_v48 = vpop.permute.xlu0 %3422 }
0x19ab   :  { %4303 = vmatmul.mubr.msk.f32.vlgmr.msra.gmra.mxu1 %vm278_vm10, %v3264_v60  ;;  %v3443_v63 = vsel %vm278_vm10, %v5005_v46, %v3423_v48 }
0x19ac   :  { %v4459_v23 = vpop.eup %4458  ;;  %4311 = vmatpush3.msra.mxu1 %v3463_v10  ;;  %v3869_v10 = vld [vmem:[%s5233_s4 + $0xe8] sm:$0xff] }
0x19ad   :  { %v3265_v27 = vmul.f32 %v4459_v23, %v4455_v37  ;;  %4312 = vmatprep.subr.mxu1 %v3461_v26  ;;  %v3866_v37 = vld [vmem:[%s5233_s4 + $0xd0] sm:$0xff] }
0x19ae   :  { %4313 = vmatpush3.msra.mxu1 %v3461_v26  ;;  %v3431_v49 = vpop.permute.xlu0 %3430  ;;  %v3860_v26 = vld [vmem:[%s5233_s4 + $0xa0] sm:$0xff] }
0x19af   :  { %4308 = vmatmul.mubr.msk.f32.vlgmr.msra.gmra.mxu0 %vm278_vm10, %v3265_v27  ;;  %4314 = vmatprep.subr.mxu1 %v3459_v25  ;;  %v3445_v0 = vsel %vm1628_vm11, %v3443_v63, %v3431_v49  ;;  %v3580_v49 = vrot.slane %v5118_v41, %v1766_v47  ;;  %v3859_v47 = vld [vmem:[%s5233_s4 + $0x98] sm:$0xff]  ;;  %v3856_v63 = vld [vmem:[%s5233_s4 + $0x80] sm:$0xff] }
0x19b0   :  { %4315 = vmatpush3.msra.mxu1 %v3459_v25  ;;  %4322 = vmatpush3.msra.mxu0 %v3855_v33 }
0x19b1   :  { %4323 = vmatprep.subr.mxu0 %v3854_v34 }
0x19b2   :  { %v3457_v51 = vpop.permute.xlu0 %3456  ;;  %4324 = vmatpush3.msra.mxu0 %v3854_v34 }
0x19b3   :  { %4316 = vmatprep.subr.mxu1 %v3457_v51  ;;  %4325 = vmatprep.subr.mxu0 %v3853_v29 }
0x19b4   :  { %4317 = vmatpush3.msra.mxu1 %v3457_v51  ;;  %4326 = vmatpush3.msra.mxu0 %v3853_v29 }
0x19b5   :  { %4327 = vmatprep.subr.mxu0 %v3852_v30  ;;  %4332 = vmatprep.subr.mxu1 %v3871_v35 }
0x19b6   :  { %4328 = vmatpush3.msra.mxu0 %v3852_v30 }
0x1a6b   :  { %v3338_v31 = vpop.f32.mrf.mxu1 }
0x1a6c   :  { %3436 = vrot.lane.b32.xlu1 %v3338_v31, %s4507_s14 }
0x1a6d   :  { %v4304_v45 = vpop.f32.mrf.mxu1 }
0x1a6e   :  { %v3586_v45 = vrot.slane %v5118_v41, %v1772_v28  ;;  %v3858_v28 = vld [vmem:[%s5233_s4 + $0x90] sm:$0xff] }
0x1a6f   :  { %v3414_v53 = vpop.f32.mrf.mxu0 }
0x1a70   :  { %3438 = vrot.lane.b32.xlu1 %v3414_v53, %s4507_s14 }
0x1a71   :  { %v4309_v54 = vpop.f32.mrf.mxu0 }
0x1ade   :  { %v3437_v61 = vpop.permute.xlu1 %3436 }
0x1adf   :  { %v3446_v62 = vsel %vm1631_vm12, %v3444_v57, %v3437_v61 }
0x1ae0   :  { %4318 = vmatprep.mubr.msk.f32.mxu1 %vm193_vm8, %v3446_v62  ;;  %v3857_v62 = vld [vmem:[%s5233_s4 + $0x88] sm:$0xff]  ;;  %s4508_s4 = smov [#allocation2]  }
0x1ae1   :  { %s3802_s12 = sshll.u32 %s4508_s4, 4  ;;  %s3803_s12 = int_to_ptr.vmem [resolvable:$true] %s3802_s12 }
0x1ae2   :  { %v3439_v2 = vpop.permute.xlu1 %3438  ;;  %s4468_s14 = scalar_lea.vmem %s3803_s12, 256  ;;  %p4473_p1 = scmp.lt.s32.totalorder %s3803_s12, %s3803_s12 }
0x1ae3   :  { %v3447_v4 = vsel %vm1631_vm12, %v3445_v0, %v3439_v2  ;;  %v3592_v0 = vrot.slane %v5118_v41, %v1778_v7  ;;  %p4469_p0 = scmp.ne.s32.totalorder %s3803_s12, %s4468_s14  ;;  %p4474_p2 = scmp.lt.s32.totalorder %s4468_s14, %s4468_s14 }
0x1ae4   :  { %4319 = vmatmul.mubr.msk.f32.vlgmr.msra.gmra.mxu1 %vm193_vm8, %v3447_v4 }
0x1ae5   :  { %4333 = vmatpush3.msra.mxu1 %v3871_v35  ;;  %p4475_p3 = por %p4474_p2, %p4473_p1 }
0x1ae6   :  { %4334 = vmatprep.subr.mxu1 %v3870_v36 }
0x1ae7   :  { %4335 = vmatpush3.msra.mxu1 %v3870_v36  ;;  %p4476_p4 = pnand %p4475_p3, %p4469_p0 }
0x1ae8   :  { %4336 = vmatprep.subr.mxu1 %v3869_v10 }
0x1ae9   :  { %4337 = vmatpush3.msra.mxu1 %v3869_v10 }
0x1aea   :  { %4338 = vmatprep.subr.mxu1 %v3868_v42 }
0x1aeb   :  { %4339 = vmatpush3.msra.mxu1 %v3868_v42 }
0x1aec   :  { %4340 = vmatprep.subr.mxu1 %v3867_v43 }
0x1aed   :  { %4341 = vmatpush3.msra.mxu1 %v3867_v43  ;;  %v3786_v43 = vrot.slane %v5118_v41, %v1972_v50 }
0x1aee   :  { %4342 = vmatprep.subr.mxu1 %v3866_v37 }
0x1aef   :  { %4343 = vmatpush3.msra.mxu1 %v3866_v37 }
0x1af0   :  { %4344 = vmatprep.subr.mxu1 %v3865_v32 }
0x1af1   :  { %4345 = vmatpush3.msra.mxu1 %v3865_v32 }
0x1af2   :  { %4346 = vmatprep.subr.mxu1 %v3864_v38 }
0x1af3   :  { %4347 = vmatpush3.msra.mxu1 %v3864_v38  ;;  %v3792_v38 = vrot.slane %v5118_v41, %v1978_v52 }
0x1af4   :  { %4348 = vmatprep.subr.mxu1 %v3863_v39 }
0x1af5   :  { %4349 = vmatpush3.msra.mxu1 %v3863_v39 }
0x1af6   :  { %4350 = vmatprep.subr.mxu1 %v3862_v40 }
0x1af7   :  { %4351 = vmatpush3.msra.mxu1 %v3862_v40 }
0x1af8   :  { %4352 = vmatprep.subr.mxu1 %v3861_v13 }
0x1af9   :  { %4353 = vmatpush3.msra.mxu1 %v3861_v13 }
0x1afa   :  { %4354 = vmatprep.subr.mxu1 %v3860_v26 }
0x1afb   :  { %4355 = vmatpush3.msra.mxu1 %v3860_v26 }
0x1afc   :  { %4356 = vmatprep.subr.mxu1 %v3859_v47 }
0x1afd   :  { %4357 = vmatpush3.msra.mxu1 %v3859_v47 }
0x1afe   :  { %4358 = vmatprep.subr.mxu1 %v3858_v28 }
0x1aff   :  { %4359 = vmatpush3.msra.mxu1 %v3858_v28 }
0x1b00   :  { %4360 = vmatprep.subr.mxu1 %v3857_v62 }
0x1b01   :  { %4361 = vmatpush3.msra.mxu1 %v3857_v62 }
0x1b02   :  { %4362 = vmatprep.subr.mxu1 %v3856_v63 }
0x1b03   :  { %4363 = vmatpush3.msra.mxu1 %v3856_v63 }
0x1ba4   :  { %v4320_v8 = vpop.f32.mrf.mxu1 }
0x1ba5   :  { %v3546_v9 = vadd.f32 %v4320_v8, %v3451_v5 }
0x1ba6   :  { %v3540_v11 = vpop.f32.mrf.mxu1 }
0x1ba7   :  { %v3550_v46 = vadd.f32 %v3546_v9, %v4941_v59  ;;  %v3541_v12 = vadd.f32 %v3540_v11, %v3451_v5 }
0x1ba9   :  { %v3549_v3 = vadd.f32 %v3541_v12, %v4939_v58  ;;  %v3554_v14 = vsel %vm193_vm8, %v3550_v46, 0.0 }
0x1baa   :  { %3555 = vadd.xlane.f32.xlu1 %v3554_v14 }
0x1bab   :  { %v3551_v16 = vsel %vm193_vm8, %v3549_v3, 0.0 }
0x1bac   :  { %3552 = vadd.xlane.f32.xlu0 %v3551_v16 }
0x1c33   :  { %v3556_v18 = vpop.xlane.xlu1 %3555 }
0x1c34   :  { %v3558_v19 = vmul.f32 0.03125, %v3556_v18 }
0x1c35   :  { %v3553_v20 = vpop.xlane.xlu0 %3552 }
0x1c36   :  { %v3557_v21 = vmul.f32 0.03125, %v3553_v20  ;;  %v5127_v22 = vsub.f32 %v3550_v46, %v3558_v19  ;;  %v3679_v46 = vrot.slane %v5118_v41, %v1865_v17 }
0x1c38   :  { %v5129_v1 = vsub.f32 %v3549_v3, %v3557_v21  ;;  %v3562_v58 = vmul.f32 %v5127_v22, %v5127_v22 }
0x1c3a   :  { %v3561_v59 = vmul.f32 %v5129_v1, %v5129_v1  ;;  %v3566_v6 = vsel %vm193_vm8, %v3562_v58, 0.0 }
0x1c3c   :  { %v3563_v24 = vsel %vm193_vm8, %v3561_v59, 0.0 }
0x1c3d   :  { %3564 = vadd.xlane.f32.xlu0 %v3563_v24 }
0x1c41   :  { %3567 = vadd.xlane.f32.xlu0 %v3566_v6 }
0x1cc6   :  { %v3565_v60 = vpop.xlane.xlu0 %3564 }
0x1cc7   :  { %v3569_v23 = vmul.f32 0.03125, %v3565_v60 }
0x1cc9   :  { %v3571_v27 = vadd.f32 1e-05, %v3569_v23 }
0x1cca   :  { %v3568_v25 = vpop.xlane.xlu0 %3567 }
0x1ccb   :  { %4460 = vrsqrt.f32 %v3571_v27  ;;  %v3570_v44 = vmul.f32 0.03125, %v3568_v25 }
0x1ccd   :  { %v3572_v48 = vadd.f32 1e-05, %v3570_v44 }
0x1ccf   :  { %4462 = vrsqrt.f32 %v3572_v48 }
0x1cd8   :  { %v4461_v51 = vpop.eup %4460 }
0x1cd9   :  { %v3575_v31 = vmul.f32 %v4461_v51, %v5129_v1 }
0x1cdb   :  { %v3581_v53 = vmul.f32 %v3580_v49, %v3575_v31 }
0x1cdc   :  { %v4463_v54 = vpop.eup %4462 }
0x1cdd   :  { %v3576_v55 = vmul.f32 %v4463_v54, %v5127_v22  ;;  %v3587_v56 = vadd.f32 %v3586_v45, %v3581_v53 }
0x1cdf   :  { %v3582_v57 = vmul.f32 %v3580_v49, %v3576_v55  ;;  %4329 = vmatprep.mubr.msk.f32.mxu0 %vm193_vm8, %v3587_v56 }
0x1ce1   :  { %v3588_v61 = vadd.f32 %v3586_v45, %v3582_v57 }
0x1ce3   :  { %4330 = vmatmul.mubr.msk.f32.vlgmr.msra.gmra.mxu0 %vm193_vm8, %v3588_v61 }
0x1da3   :  { %v4331_v2 = vpop.f32.mrf.mxu0 }
0x1da4   :  { %v3671_v4 = vadd.f32 %v4331_v2, %v3592_v0 }
0x1da5   :  { %v3665_v5 = vpop.f32.mrf.mxu0 }
0x1da6   :  { %v3666_v8 = vadd.f32 %v3665_v5, %v3592_v0  ;;  %v3675_v11 = vmax.f32 %v3671_v4, 0.0 }
0x1da8   :  { %v3674_v9 = vmax.f32 %v3666_v8, 0.0 }
0x1daa   :  { %4364 = vmatprep.mubr.f32.mxu1 %v3674_v9 }
0x1dab   :  { %4365 = vmatmul.mubr.f32.vlgmr.msra.gmra.mxu1 %v3675_v11 }
0x1e6b   :  { %v4366_v12 = vpop.f32.mrf.mxu1 }
0x1e6c   :  { %v3752_v3 = vadd.f32 %v4366_v12, %v3679_v46 }
0x1e6d   :  { %v3746_v14 = vpop.f32.mrf.mxu1 }
0x1e6e   :  { %v3756_v16 = vadd.f32 %v3752_v3, %v3588_v61  ;;  %v3747_v18 = vadd.f32 %v3746_v14, %v3679_v46 }
0x1e70   :  { %v3755_v19 = vadd.f32 %v3747_v18, %v3587_v56  ;;  %v3760_v7 = vsel %vm193_vm8, %v3756_v16, 0.0 }
0x1e71   :  { %3761 = vadd.xlane.f32.xlu0 %v3760_v7 }
0x1e72   :  { %v3757_v20 = vsel %vm193_vm8, %v3755_v19, 0.0 }
0x1e73   :  { %3758 = vadd.xlane.f32.xlu1 %v3757_v20 }
0x1efa   :  { %v3762_v21 = vpop.xlane.xlu0 %3761 }
0x1efb   :  { %v3764_v22 = vmul.f32 0.03125, %v3762_v21 }
0x1efc   :  { %v3759_v1 = vpop.xlane.xlu1 %3758 }
0x1efd   :  { %v3766_v59 = vsub.f32 %v3756_v16, %v3764_v22  ;;  %v3763_v24 = vmul.f32 0.03125, %v3759_v1 }
0x1eff   :  { %v3765_v58 = vsub.f32 %v3755_v19, %v3763_v24  ;;  %v3768_v6 = vmul.f32 %v3766_v59, %v3766_v59 }
0x1f01   :  { %v3772_v17 = vsel %vm193_vm8, %v3768_v6, 0.0  ;;  %v3767_v33 = vmul.f32 %v3765_v58, %v3765_v58 }
0x1f02   :  { %3773 = vadd.xlane.f32.xlu0 %v3772_v17 }
0x1f03   :  { %v3769_v34 = vsel %vm193_vm8, %v3767_v33, 0.0 }
0x1f04   :  { %3770 = vadd.xlane.f32.xlu1 %v3769_v34 }
0x1f8b   :  { %v3774_v29 = vpop.xlane.xlu0 %3773 }
0x1f8c   :  { %v3776_v30 = vmul.f32 0.03125, %v3774_v29 }
0x1f8d   :  { %v3771_v35 = vpop.xlane.xlu1 %3770 }
0x1f8e   :  { %v3778_v36 = vadd.f32 1e-05, %v3776_v30  ;;  %v3775_v10 = vmul.f32 0.03125, %v3771_v35 }
0x1f90   :  { %4464 = vrsqrt.f32 %v3778_v36  ;;  %v3777_v42 = vadd.f32 1e-05, %v3775_v10 }
0x1f92   :  { %4466 = vrsqrt.f32 %v3777_v42 }
0x1f9d   :  { %v4465_v37 = vpop.eup %4464 }
0x1f9e   :  { %v3782_v32 = vmul.f32 %v4465_v37, %v3766_v59 }
0x1f9f   :  { %v4467_v39 = vpop.eup %4466 }
0x1fa0   :  { %v3781_v40 = vmul.f32 %v4467_v39, %v3765_v58  ;;  %v3788_v13 = vmul.f32 %v3786_v43, %v3782_v32 }
0x1fa2   :  { %v3787_v26 = vmul.f32 %v3786_v43, %v3781_v40  ;;  %v3794_v60 = vadd.f32 %v3792_v38, %v3788_v13 }
0x1fa4   :  { %v3793_v23 = vadd.f32 %v3792_v38, %v3787_v26  ;;  %3796 = vst.msk [vmem:[#allocation2 + $0x8] sm:$0xff] %vm193_vm8, %v3794_v60 }
0x1fa6   :  { %3795 = vst.msk [vmem:[#allocation2] sm:$0xff] %vm193_vm8, %v3793_v23 }
0x1fa7   :  { %4479 = shalt.err (!%p4476_p4)
}
0x1fa8   :  { %s4509_s20 = smov 128  }
0x1fa9   :  { %3808 = dma.vmem_to_hbm [thread:$0]  %s3803_s12, 256, %s5235_s6, [#allocation3], %s4509_s20, %s4509_s20, %s4506_s13  }
0x1faa   :  { %4488 = dma.done.wait [#allocation3], 256  }
0x1fab   :  { %4489 = vsyncadd [#allocation3], 4294967040 }
0x1fac   :  { %3812 = vsyncpa [#allocation3], 1 }

</bundles_post_ra>
